<compile_context>
chip_gen: v7x
topology: tpu7x:2x2x1
jax: 0.10.0
libtpu: 0.0.40
codegen_flags: <defaults>
</compile_context>

<pallas_src>
import math
import jax
import jax.numpy as jnp
from jax.experimental import pallas as pl
from jax.experimental.pallas import tpu as pltpu

# ----------------------- config (small, BERT-like) -----------------------
VOCAB = 50
MAX_POS = 16
TYPE_VOCAB = 2
HIDDEN = 32
NUM_HEADS = 4
HEAD_DIM = HIDDEN // NUM_HEADS
INTERMEDIATE = 64
NUM_LAYERS = 2
EPS = 1e-12          # layer_norm_eps
BATCH = 2
SEQ = 8
ATTN_SCALE = 1.0 / math.sqrt(HEAD_DIM)
# hidden_dropout_prob / attention dropout: inference no-ops here.


def _layernorm(x, gamma, beta):
    mean = jnp.mean(x, axis=-1, keepdims=True)
    var = jnp.mean((x - mean) ** 2, axis=-1, keepdims=True)
    return (x - mean) * jax.lax.rsqrt(var + EPS) * gamma + beta


def _dot(a, w):
    # activations cast to the (bf16) weight dtype at the MXU boundary; f32 accumulation.
    return jnp.dot(a.astype(w.dtype), w, preferred_element_type=jnp.float32)


# ----------------------- fused kernel -----------------------
def bert_mlm_kernel(word_ref, pos_ref, type_ref, bias_ref, onehot_ref,
                    emb_g_ref, emb_b_ref,
                    wqkv_ref, bqkv_ref, wo_ref, bo_ref,
                    ln1_g_ref, ln1_b_ref,
                    wi_ref, bi_ref, w2_ref, b2_ref,
                    ln2_g_ref, ln2_b_ref,
                    wt_ref, bt_ref, ln3_g_ref, ln3_b_ref,
                    wd_ref, bd_ref,
                    scores_ref, loss_ref):
    B, S, H, NH, HD = BATCH, SEQ, HIDDEN, NUM_HEADS, HEAD_DIM

    # ---- Embeddings: word + position + token-type, then LayerNorm ----
    pos = pos_ref[...]                                    # [S, H]
    x = word_ref[...] + jnp.tile(pos, (B, 1)) + type_ref[...]      # [B*S, H]
    x = _layernorm(x, emb_g_ref[...], emb_b_ref[...])

    # Block-diagonal additive attention bias over the flattened batch:
    #   0      for (query, key) in the same batch element and key un-padded
    #   -1e4   otherwise  (exp underflows to exactly 0 -> batches never mix)
    bias = bias_ref[...]                                  # [B*S, B*S]

    # ---- encoder stack (static unroll over layers; hidden stays resident) ----
    for l in range(NUM_LAYERS):
        # fused QKV projection for the whole [B*S, H] block
        # (1/sqrt(head_dim) already folded into the Wq / bq slices at init time)
        qkv = _dot(x, wqkv_ref[l]) + bqkv_ref[l]          # [B*S, 3H], f32
        q = qkv[:, 0:H]
        k = qkv[:, H:2 * H]
        v = qkv[:, 2 * H:3 * H]

        # attention: static loop over heads only; batch handled by the block-diagonal
        # bias. Per-head ctx is folded into the output projection (ctx_h @ Wo[h]) and
        # accumulated — no head concatenate, no batch concatenate.
        attn = jnp.zeros((B * S, H), jnp.float32)
        for h in range(NH):
            lanes = slice(h * HD, (h + 1) * HD)
            qh = q[:, lanes]                              # [B*S, HD]
            kh = k[:, lanes]
            vh = v[:, lanes]
            s_h = jnp.dot(qh, kh.T, preferred_element_type=jnp.float32) + bias
            s_h = s_h - jnp.max(s_h, axis=-1, keepdims=True)
            p = jnp.exp(s_h)
            p = p * pl.reciprocal(jnp.sum(p, axis=-1, keepdims=True), approx=True)
            ctx = jnp.dot(p, vh, preferred_element_type=jnp.float32)      # [B*S, HD]
            attn = attn + _dot(ctx, wo_ref[l, h])         # [B*S, H]
        attn = attn + bo_ref[l]

        # Attention block: post-norm residual
        h1 = _layernorm(x + attn, ln1_g_ref[l], ln1_b_ref[l])

        # FeedForward
        ff = _dot(h1, wi_ref[l]) + bi_ref[l]
        ff = jax.nn.gelu(ff, approximate=True)  # TODO(synk): exact erf GELU for strict HF parity
        ff = _dot(ff, w2_ref[l]) + b2_ref[l]

        # TransformerEncoder: LayerNorm(att_output + ffn_output); dropout = inference no-op
        x = _layernorm(h1 + ff, ln2_g_ref[l], ln2_b_ref[l])

    # ---- MLM head: dense + GELU + LayerNorm, then decode to vocab ----
    t = _dot(x, wt_ref[...]) + bt_ref[...]
    t = jax.nn.gelu(t, approximate=True)
    t = _layernorm(t, ln3_g_ref[...], ln3_b_ref[...])
    logits = _dot(t, wd_ref[...]) + bd_ref[...]           # [B*S, V]
    scores_ref[...] = logits

    # ---- per-token cross-entropy (labels as one-hot; mean reduction in wrapper) ----
    m = jnp.max(logits, axis=-1, keepdims=True)
    lse = m + jnp.log(jnp.sum(jnp.exp(logits - m), axis=-1, keepdims=True))
    picked = jnp.sum(onehot_ref[...] * logits, axis=-1, keepdims=True)
    loss_ref[...] = lse - picked                          # [B*S, 1]


# ----------------------- pallas_call wrapper -----------------------
def _fused_forward(word_flat, pos_s, type_row, attn_bias, onehot, p):
    n_in = 25
    vmem = pl.BlockSpec(memory_space=pltpu.MemorySpace.VMEM)
    fn = pl.pallas_call(
        bert_mlm_kernel,
        out_shape=(jax.ShapeDtypeStruct((BATCH * SEQ, VOCAB), jnp.float32),
                   jax.ShapeDtypeStruct((BATCH * SEQ, 1), jnp.float32)),
        in_specs=[vmem] * n_in,
        out_specs=(vmem, vmem),
    )
    return fn(word_flat, pos_s, type_row, attn_bias, onehot,
              p["emb_ln_g"], p["emb_ln_b"],
              p["wqkv"], p["bqkv"], p["wo"], p["bo"],
              p["ln1_g"], p["ln1_b"],
              p["wi"], p["bi"], p["w2"], p["b2"],
              p["ln2_g"], p["ln2_b"],
              p["wt"], p["bt"], p["ln3_g"], p["ln3_b"],
              p["wd"], p["bd"])


# ----------------------- parameter init (deterministic, synthetic) -----------------------
def init_params(key):
    std = 0.02
    def normal(k, shape):
        return std * jax.random.normal(k, shape, jnp.float32)

    keys = iter(jax.random.split(key, 16))
    wdt = jnp.bfloat16   # matmul weights in bf16; biases & LN params stay f32
    L, H, I, NH, HD = NUM_LAYERS, HIDDEN, INTERMEDIATE, NUM_HEADS, HEAD_DIM

    # fused Wq|Wk|Wv with 1/sqrt(head_dim) folded into the Wq slice (and bq, here zero).
    # NOTE: when importing real checkpoint weights, apply the same fold to Wq / bq.
    wqkv = normal(next(keys), (L, H, 3 * H))
    wqkv = wqkv.at[:, :, 0:H].multiply(ATTN_SCALE)

    p = {
        "word_emb": normal(next(keys), (VOCAB, HIDDEN)),
        "pos_emb":  normal(next(keys), (MAX_POS, HIDDEN)),
        "type_emb": normal(next(keys), (TYPE_VOCAB, HIDDEN)),
        "emb_ln_g": jnp.ones((1, HIDDEN), jnp.float32),
        "emb_ln_b": jnp.zeros((1, HIDDEN), jnp.float32),
        # per-layer weights stacked on a leading layer axis (one pallas operand each);
        # stored [in, out] so the kernel computes x @ W + b  (== nn.Linear)
        "wqkv": wqkv.astype(wdt),
        "bqkv": jnp.zeros((L, 1, 3 * H), jnp.float32),
        "wo":   normal(next(keys), (L, NH, HD, H)).astype(wdt),   # Wo pre-split per head
        "bo":   jnp.zeros((L, 1, H), jnp.float32),
        "ln1_g": jnp.ones((L, 1, H), jnp.float32),
        "ln1_b": jnp.zeros((L, 1, H), jnp.float32),
        "wi":   normal(next(keys), (L, H, I)).astype(wdt),
        "bi":   jnp.zeros((L, 1, I), jnp.float32),
        "w2":   normal(next(keys), (L, I, H)).astype(wdt),
        "b2":   jnp.zeros((L, 1, H), jnp.float32),
        "ln2_g": jnp.ones((L, 1, H), jnp.float32),
        "ln2_b": jnp.zeros((L, 1, H), jnp.float32),
        # MLM head (transform dense + GELU + LN, then decoder-to-vocab + bias)
        "wt":   normal(next(keys), (H, H)).astype(wdt),
        "bt":   jnp.zeros((1, H), jnp.float32),
        "ln3_g": jnp.ones((1, H), jnp.float32),
        "ln3_b": jnp.zeros((1, H), jnp.float32),
        "wd":   normal(next(keys), (H, VOCAB)).astype(wdt),
        "bd":   jnp.zeros((1, VOCAB), jnp.float32),
    }
    return p


# ----------------------- full model: BertForMLM.forward -----------------------
def bert_forward(params, input_ids, attention_mask, labels):
    B, S = input_ids.shape
    # plain-JAX glue: embedding-table gather + mask/label prep (tiny)
    word_flat = params["word_emb"][input_ids].reshape(B * S, HIDDEN)       # [B*S, H]
    pos_s = params["pos_emb"][:S]                                          # [S, H]
    type_row = params["type_emb"][0:1]                                     # [1, H]  (token_type_ids = 0)

    # [B*S, B*S] additive bias: 0 iff key is in the same batch element AND un-padded,
    # else -10000 (matches (1 - mask) * -1e4 applied per batch in the reference).
    batch_idx = jnp.repeat(jnp.arange(B), S)                               # [B*S]
    key_valid = attention_mask.reshape(-1) > 0                             # [B*S]
    same_batch = batch_idx[:, None] == batch_idx[None, :]
    attn_bias = jnp.where(same_batch & key_valid[None, :], 0.0, -10000.0).astype(jnp.float32)

    onehot = jax.nn.one_hot(labels.reshape(-1), VOCAB, dtype=jnp.float32)  # [B*S, V]

    scores_flat, loss_tok = _fused_forward(word_flat, pos_s, type_row,
                                           attn_bias, onehot, params)
    scores = scores_flat.reshape(B, S, VOCAB)
    mlm_loss = jnp.mean(loss_tok)   # CrossEntropyLoss default 'mean' reduction
    return mlm_loss, scores


if __name__ == "__main__":
    key = jax.random.PRNGKey(0)
    k_param, k_ids, k_lbl = jax.random.split(key, 3)

    params = init_params(k_param)
    input_ids = jax.random.randint(k_ids, (BATCH, SEQ), 0, VOCAB, dtype=jnp.int32)
    labels = jax.random.randint(k_lbl, (BATCH, SEQ), 0, VOCAB, dtype=jnp.int32)
    attention_mask = jnp.ones((BATCH, SEQ), jnp.int32).at[1, -2:].set(0)

    fwd = jax.jit(bert_forward)
    mlm_loss, scores = jax.block_until_ready(fwd(params, input_ids, attention_mask, labels))

    assert scores.shape == (BATCH, SEQ, VOCAB)
    assert bool(jnp.isfinite(mlm_loss))
    assert bool(jnp.all(jnp.isfinite(scores)))
    print("KERNEL_OK")
</pallas_src>

<mosaic_0001>
module attributes {stable_mosaic.version = 11 : i64} {
  func.func @bert_mlm_kernel(%arg0: memref<16x32xf32, #tpu.memory_space<vmem>>, %arg1: memref<8x32xf32, #tpu.memory_space<vmem>>, %arg2: memref<1x32xf32, #tpu.memory_space<vmem>>, %arg3: memref<16x16xf32, #tpu.memory_space<vmem>>, %arg4: memref<16x50xf32, #tpu.memory_space<vmem>>, %arg5: memref<1x32xf32, #tpu.memory_space<vmem>>, %arg6: memref<1x32xf32, #tpu.memory_space<vmem>>, %arg7: memref<2x32x96xbf16, #tpu.memory_space<vmem>>, %arg8: memref<2x1x96xf32, #tpu.memory_space<vmem>>, %arg9: memref<2x4x8x32xbf16, #tpu.memory_space<vmem>>, %arg10: memref<2x1x32xf32, #tpu.memory_space<vmem>>, %arg11: memref<2x1x32xf32, #tpu.memory_space<vmem>>, %arg12: memref<2x1x32xf32, #tpu.memory_space<vmem>>, %arg13: memref<2x32x64xbf16, #tpu.memory_space<vmem>>, %arg14: memref<2x1x64xf32, #tpu.memory_space<vmem>>, %arg15: memref<2x64x32xbf16, #tpu.memory_space<vmem>>, %arg16: memref<2x1x32xf32, #tpu.memory_space<vmem>>, %arg17: memref<2x1x32xf32, #tpu.memory_space<vmem>>, %arg18: memref<2x1x32xf32, #tpu.memory_space<vmem>>, %arg19: memref<32x32xbf16, #tpu.memory_space<vmem>>, %arg20: memref<1x32xf32, #tpu.memory_space<vmem>>, %arg21: memref<1x32xf32, #tpu.memory_space<vmem>>, %arg22: memref<1x32xf32, #tpu.memory_space<vmem>>, %arg23: memref<32x50xbf16, #tpu.memory_space<vmem>>, %arg24: memref<1x50xf32, #tpu.memory_space<vmem>>, %arg25: memref<16x50xf32, #tpu.memory_space<vmem>>, %arg26: memref<16x1xf32, #tpu.memory_space<vmem>>) attributes {dimension_semantics = [], scalar_prefetch = 0 : i64, scratch_operands = 0 : i64, tpu.core_type = #tpu.core_type<tc>} {
    %c0 = arith.constant 0 : index
    %c0_0 = arith.constant 0 : index
    %0 = vector.load %arg1[%c0, %c0_0] : memref<8x32xf32, #tpu.memory_space<vmem>>, vector<8x32xf32>
    %c0_1 = arith.constant 0 : index
    %c0_2 = arith.constant 0 : index
    %1 = vector.load %arg0[%c0_1, %c0_2] : memref<16x32xf32, #tpu.memory_space<vmem>>, vector<16x32xf32>
    %2 = tpu.concatenate %0, %0 in 0 : vector<8x32xf32>, vector<8x32xf32> -> vector<16x32xf32>
    %3 = arith.addf %1, %2 : vector<16x32xf32>
    %c0_3 = arith.constant 0 : index
    %c0_4 = arith.constant 0 : index
    %4 = vector.load %arg2[%c0_3, %c0_4] : memref<1x32xf32, #tpu.memory_space<vmem>>, vector<1x32xf32>
    %5 = vector.broadcast %4 : vector<1x32xf32> to vector<16x32xf32>
    %6 = arith.addf %3, %5 : vector<16x32xf32>
    %c0_5 = arith.constant 0 : index
    %c0_6 = arith.constant 0 : index
    %7 = vector.load %arg5[%c0_5, %c0_6] : memref<1x32xf32, #tpu.memory_space<vmem>>, vector<1x32xf32>
    %c0_7 = arith.constant 0 : index
    %c0_8 = arith.constant 0 : index
    %8 = vector.load %arg6[%c0_7, %c0_8] : memref<1x32xf32, #tpu.memory_space<vmem>>, vector<1x32xf32>
    %cst = arith.constant dense<0.000000e+00> : vector<16xf32>
    %9 = vector.multi_reduction <add>, %6, %cst [1] : vector<16x32xf32> to vector<16xf32>
    %10 = vector.shape_cast %9 : vector<16xf32> to vector<16x1xf32>
    %cst_9 = arith.constant 3.200000e+01 : f32
    %11 = vector.broadcast %cst_9 : f32 to vector<16x1xf32>
    %12 = arith.divf %10, %11 : vector<16x1xf32>
    %13 = vector.broadcast %12 : vector<16x1xf32> to vector<16x32xf32>
    %14 = arith.subf %6, %13 : vector<16x32xf32>
    %15 = arith.mulf %14, %14 : vector<16x32xf32>
    %cst_10 = arith.constant dense<0.000000e+00> : vector<16xf32>
    %16 = vector.multi_reduction <add>, %15, %cst_10 [1] : vector<16x32xf32> to vector<16xf32>
    %17 = vector.shape_cast %16 : vector<16xf32> to vector<16x1xf32>
    %cst_11 = arith.constant 3.200000e+01 : f32
    %18 = vector.broadcast %cst_11 : f32 to vector<16x1xf32>
    %19 = arith.divf %17, %18 : vector<16x1xf32>
    %20 = vector.broadcast %12 : vector<16x1xf32> to vector<16x32xf32>
    %21 = arith.subf %6, %20 : vector<16x32xf32>
    %cst_12 = arith.constant 9.99999996E-13 : f32
    %22 = vector.broadcast %cst_12 : f32 to vector<16x1xf32>
    %23 = arith.addf %19, %22 : vector<16x1xf32>
    %24 = math.rsqrt %23 : vector<16x1xf32>
    %25 = vector.broadcast %24 : vector<16x1xf32> to vector<16x32xf32>
    %26 = arith.mulf %21, %25 : vector<16x32xf32>
    %27 = vector.broadcast %7 : vector<1x32xf32> to vector<16x32xf32>
    %28 = arith.mulf %26, %27 : vector<16x32xf32>
    %29 = vector.broadcast %8 : vector<1x32xf32> to vector<16x32xf32>
    %30 = arith.addf %28, %29 : vector<16x32xf32>
    %c0_13 = arith.constant 0 : index
    %c0_14 = arith.constant 0 : index
    %31 = vector.load %arg3[%c0_13, %c0_14] : memref<16x16xf32, #tpu.memory_space<vmem>>, vector<16x16xf32>
    %c0_15 = arith.constant 0 : index
    %c0_16 = arith.constant 0 : index
    %c0_17 = arith.constant 0 : index
    %32 = vector.load %arg7[%c0_15, %c0_16, %c0_17] : memref<2x32x96xbf16, #tpu.memory_space<vmem>>, vector<1x32x96xbf16>
    %33 = vector.shape_cast %32 : vector<1x32x96xbf16> to vector<32x96xbf16>
    %34 = arith.truncf %30 : vector<16x32xf32> to vector<16x32xbf16>
    %cst_18 = arith.constant dense<0.000000e+00> : vector<16x96xf32>
    %35 = tpu.matmul %34, %33, %cst_18 {dimension_numbers = #tpu.dot_dimension_numbers<[1], [0], [0], [1], [0, 0, 1, 1], [], []>} : vector<16x32xbf16>, vector<32x96xbf16>, vector<16x96xf32> -> vector<16x96xf32>
    %c0_19 = arith.constant 0 : index
    %c0_20 = arith.constant 0 : index
    %c0_21 = arith.constant 0 : index
    %36 = vector.load %arg8[%c0_19, %c0_20, %c0_21] : memref<2x1x96xf32, #tpu.memory_space<vmem>>, vector<1x1x96xf32>
    %37 = vector.shape_cast %36 : vector<1x1x96xf32> to vector<1x96xf32>
    %38 = vector.broadcast %37 : vector<1x96xf32> to vector<16x96xf32>
    %39 = arith.addf %35, %38 : vector<16x96xf32>
    %40 = vector.extract_strided_slice %39 {offsets = [0, 0], sizes = [16, 32], strides = [1, 1]} : vector<16x96xf32> to vector<16x32xf32>
    %41 = vector.extract_strided_slice %39 {offsets = [0, 32], sizes = [16, 32], strides = [1, 1]} : vector<16x96xf32> to vector<16x32xf32>
    %42 = vector.extract_strided_slice %39 {offsets = [0, 64], sizes = [16, 32], strides = [1, 1]} : vector<16x96xf32> to vector<16x32xf32>
    %cst_22 = arith.constant 0.000000e+00 : f32
    %43 = vector.broadcast %cst_22 : f32 to vector<16x32xf32>
    %44 = vector.extract_strided_slice %40 {offsets = [0, 0], sizes = [16, 8], strides = [1, 1]} : vector<16x32xf32> to vector<16x8xf32>
    %45 = vector.extract_strided_slice %41 {offsets = [0, 0], sizes = [16, 8], strides = [1, 1]} : vector<16x32xf32> to vector<16x8xf32>
    %46 = vector.extract_strided_slice %42 {offsets = [0, 0], sizes = [16, 8], strides = [1, 1]} : vector<16x32xf32> to vector<16x8xf32>
    %47 = tpu.transpose %45, [1, 0] : vector<16x8xf32> -> vector<8x16xf32>
    %cst_23 = arith.constant dense<0.000000e+00> : vector<16x16xf32>
    %48 = tpu.matmul %44, %47, %cst_23 {dimension_numbers = #tpu.dot_dimension_numbers<[1], [0], [0], [1], [0, 0, 1, 1], [], []>} : vector<16x8xf32>, vector<8x16xf32>, vector<16x16xf32> -> vector<16x16xf32>
    %49 = arith.addf %48, %31 : vector<16x16xf32>
    %cst_24 = arith.constant dense<0xFF800000> : vector<16xf32>
    %50 = vector.multi_reduction <maximumf>, %49, %cst_24 [1] : vector<16x16xf32> to vector<16xf32>
    %51 = vector.shape_cast %50 : vector<16xf32> to vector<16x1xf32>
    %52 = vector.broadcast %51 : vector<16x1xf32> to vector<16x16xf32>
    %53 = arith.subf %49, %52 : vector<16x16xf32>
    %54 = math.exp %53 : vector<16x16xf32>
    %cst_25 = arith.constant dense<0.000000e+00> : vector<16xf32>
    %55 = vector.multi_reduction <add>, %54, %cst_25 [1] : vector<16x16xf32> to vector<16xf32>
    %56 = vector.shape_cast %55 : vector<16xf32> to vector<16x1xf32>
    %57 = tpu.reciprocal %56 {approx = true} : vector<16x1xf32> -> vector<16x1xf32>
    %58 = vector.broadcast %57 : vector<16x1xf32> to vector<16x16xf32>
    %59 = arith.mulf %54, %58 : vector<16x16xf32>
    %cst_26 = arith.constant dense<0.000000e+00> : vector<16x8xf32>
    %60 = tpu.matmul %59, %46, %cst_26 {dimension_numbers = #tpu.dot_dimension_numbers<[1], [0], [0], [1], [0, 0, 1, 1], [], []>} : vector<16x16xf32>, vector<16x8xf32>, vector<16x8xf32> -> vector<16x8xf32>
    %c0_27 = arith.constant 0 : index
    %c0_28 = arith.constant 0 : index
    %c0_29 = arith.constant 0 : index
    %c0_30 = arith.constant 0 : index
    %61 = vector.load %arg9[%c0_27, %c0_28, %c0_29, %c0_30] : memref<2x4x8x32xbf16, #tpu.memory_space<vmem>>, vector<1x1x8x32xbf16>
    %62 = vector.shape_cast %61 : vector<1x1x8x32xbf16> to vector<8x32xbf16>
    %63 = arith.truncf %60 : vector<16x8xf32> to vector<16x8xbf16>
    %cst_31 = arith.constant dense<0.000000e+00> : vector<16x32xf32>
    %64 = tpu.matmul %63, %62, %cst_31 {dimension_numbers = #tpu.dot_dimension_numbers<[1], [0], [0], [1], [0, 0, 1, 1], [], []>} : vector<16x8xbf16>, vector<8x32xbf16>, vector<16x32xf32> -> vector<16x32xf32>
    %65 = arith.addf %43, %64 : vector<16x32xf32>
    %66 = vector.extract_strided_slice %40 {offsets = [0, 8], sizes = [16, 8], strides = [1, 1]} : vector<16x32xf32> to vector<16x8xf32>
    %67 = vector.extract_strided_slice %41 {offsets = [0, 8], sizes = [16, 8], strides = [1, 1]} : vector<16x32xf32> to vector<16x8xf32>
    %68 = vector.extract_strided_slice %42 {offsets = [0, 8], sizes = [16, 8], strides = [1, 1]} : vector<16x32xf32> to vector<16x8xf32>
    %69 = tpu.transpose %67, [1, 0] : vector<16x8xf32> -> vector<8x16xf32>
    %cst_32 = arith.constant dense<0.000000e+00> : vector<16x16xf32>
    %70 = tpu.matmul %66, %69, %cst_32 {dimension_numbers = #tpu.dot_dimension_numbers<[1], [0], [0], [1], [0, 0, 1, 1], [], []>} : vector<16x8xf32>, vector<8x16xf32>, vector<16x16xf32> -> vector<16x16xf32>
    %71 = arith.addf %70, %31 : vector<16x16xf32>
    %cst_33 = arith.constant dense<0xFF800000> : vector<16xf32>
    %72 = vector.multi_reduction <maximumf>, %71, %cst_33 [1] : vector<16x16xf32> to vector<16xf32>
    %73 = vector.shape_cast %72 : vector<16xf32> to vector<16x1xf32>
    %74 = vector.broadcast %73 : vector<16x1xf32> to vector<16x16xf32>
    %75 = arith.subf %71, %74 : vector<16x16xf32>
    %76 = math.exp %75 : vector<16x16xf32>
    %cst_34 = arith.constant dense<0.000000e+00> : vector<16xf32>
    %77 = vector.multi_reduction <add>, %76, %cst_34 [1] : vector<16x16xf32> to vector<16xf32>
    %78 = vector.shape_cast %77 : vector<16xf32> to vector<16x1xf32>
    %79 = tpu.reciprocal %78 {approx = true} : vector<16x1xf32> -> vector<16x1xf32>
    %80 = vector.broadcast %79 : vector<16x1xf32> to vector<16x16xf32>
    %81 = arith.mulf %76, %80 : vector<16x16xf32>
    %cst_35 = arith.constant dense<0.000000e+00> : vector<16x8xf32>
    %82 = tpu.matmul %81, %68, %cst_35 {dimension_numbers = #tpu.dot_dimension_numbers<[1], [0], [0], [1], [0, 0, 1, 1], [], []>} : vector<16x16xf32>, vector<16x8xf32>, vector<16x8xf32> -> vector<16x8xf32>
    %c0_36 = arith.constant 0 : index
    %c1 = arith.constant 1 : index
    %c0_37 = arith.constant 0 : index
    %c0_38 = arith.constant 0 : index
    %83 = vector.load %arg9[%c0_36, %c1, %c0_37, %c0_38] : memref<2x4x8x32xbf16, #tpu.memory_space<vmem>>, vector<1x1x8x32xbf16>
    %84 = vector.shape_cast %83 : vector<1x1x8x32xbf16> to vector<8x32xbf16>
    %85 = arith.truncf %82 : vector<16x8xf32> to vector<16x8xbf16>
    %cst_39 = arith.constant dense<0.000000e+00> : vector<16x32xf32>
    %86 = tpu.matmul %85, %84, %cst_39 {dimension_numbers = #tpu.dot_dimension_numbers<[1], [0], [0], [1], [0, 0, 1, 1], [], []>} : vector<16x8xbf16>, vector<8x32xbf16>, vector<16x32xf32> -> vector<16x32xf32>
    %87 = arith.addf %65, %86 : vector<16x32xf32>
    %88 = vector.extract_strided_slice %40 {offsets = [0, 16], sizes = [16, 8], strides = [1, 1]} : vector<16x32xf32> to vector<16x8xf32>
    %89 = vector.extract_strided_slice %41 {offsets = [0, 16], sizes = [16, 8], strides = [1, 1]} : vector<16x32xf32> to vector<16x8xf32>
    %90 = vector.extract_strided_slice %42 {offsets = [0, 16], sizes = [16, 8], strides = [1, 1]} : vector<16x32xf32> to vector<16x8xf32>
    %91 = tpu.transpose %89, [1, 0] : vector<16x8xf32> -> vector<8x16xf32>
    %cst_40 = arith.constant dense<0.000000e+00> : vector<16x16xf32>
    %92 = tpu.matmul %88, %91, %cst_40 {dimension_numbers = #tpu.dot_dimension_numbers<[1], [0], [0], [1], [0, 0, 1, 1], [], []>} : vector<16x8xf32>, vector<8x16xf32>, vector<16x16xf32> -> vector<16x16xf32>
    %93 = arith.addf %92, %31 : vector<16x16xf32>
    %cst_41 = arith.constant dense<0xFF800000> : vector<16xf32>
    %94 = vector.multi_reduction <maximumf>, %93, %cst_41 [1] : vector<16x16xf32> to vector<16xf32>
    %95 = vector.shape_cast %94 : vector<16xf32> to vector<16x1xf32>
    %96 = vector.broadcast %95 : vector<16x1xf32> to vector<16x16xf32>
    %97 = arith.subf %93, %96 : vector<16x16xf32>
    %98 = math.exp %97 : vector<16x16xf32>
    %cst_42 = arith.constant dense<0.000000e+00> : vector<16xf32>
    %99 = vector.multi_reduction <add>, %98, %cst_42 [1] : vector<16x16xf32> to vector<16xf32>
    %100 = vector.shape_cast %99 : vector<16xf32> to vector<16x1xf32>
    %101 = tpu.reciprocal %100 {approx = true} : vector<16x1xf32> -> vector<16x1xf32>
    %102 = vector.broadcast %101 : vector<16x1xf32> to vector<16x16xf32>
    %103 = arith.mulf %98, %102 : vector<16x16xf32>
    %cst_43 = arith.constant dense<0.000000e+00> : vector<16x8xf32>
    %104 = tpu.matmul %103, %90, %cst_43 {dimension_numbers = #tpu.dot_dimension_numbers<[1], [0], [0], [1], [0, 0, 1, 1], [], []>} : vector<16x16xf32>, vector<16x8xf32>, vector<16x8xf32> -> vector<16x8xf32>
    %c0_44 = arith.constant 0 : index
    %c2 = arith.constant 2 : index
    %c0_45 = arith.constant 0 : index
    %c0_46 = arith.constant 0 : index
    %105 = vector.load %arg9[%c0_44, %c2, %c0_45, %c0_46] : memref<2x4x8x32xbf16, #tpu.memory_space<vmem>>, vector<1x1x8x32xbf16>
    %106 = vector.shape_cast %105 : vector<1x1x8x32xbf16> to vector<8x32xbf16>
    %107 = arith.truncf %104 : vector<16x8xf32> to vector<16x8xbf16>
    %cst_47 = arith.constant dense<0.000000e+00> : vector<16x32xf32>
    %108 = tpu.matmul %107, %106, %cst_47 {dimension_numbers = #tpu.dot_dimension_numbers<[1], [0], [0], [1], [0, 0, 1, 1], [], []>} : vector<16x8xbf16>, vector<8x32xbf16>, vector<16x32xf32> -> vector<16x32xf32>
    %109 = arith.addf %87, %108 : vector<16x32xf32>
    %110 = vector.extract_strided_slice %40 {offsets = [0, 24], sizes = [16, 8], strides = [1, 1]} : vector<16x32xf32> to vector<16x8xf32>
    %111 = vector.extract_strided_slice %41 {offsets = [0, 24], sizes = [16, 8], strides = [1, 1]} : vector<16x32xf32> to vector<16x8xf32>
    %112 = vector.extract_strided_slice %42 {offsets = [0, 24], sizes = [16, 8], strides = [1, 1]} : vector<16x32xf32> to vector<16x8xf32>
    %113 = tpu.transpose %111, [1, 0] : vector<16x8xf32> -> vector<8x16xf32>
    %cst_48 = arith.constant dense<0.000000e+00> : vector<16x16xf32>
    %114 = tpu.matmul %110, %113, %cst_48 {dimension_numbers = #tpu.dot_dimension_numbers<[1], [0], [0], [1], [0, 0, 1, 1], [], []>} : vector<16x8xf32>, vector<8x16xf32>, vector<16x16xf32> -> vector<16x16xf32>
    %115 = arith.addf %114, %31 : vector<16x16xf32>
    %cst_49 = arith.constant dense<0xFF800000> : vector<16xf32>
    %116 = vector.multi_reduction <maximumf>, %115, %cst_49 [1] : vector<16x16xf32> to vector<16xf32>
    %117 = vector.shape_cast %116 : vector<16xf32> to vector<16x1xf32>
    %118 = vector.broadcast %117 : vector<16x1xf32> to vector<16x16xf32>
    %119 = arith.subf %115, %118 : vector<16x16xf32>
    %120 = math.exp %119 : vector<16x16xf32>
    %cst_50 = arith.constant dense<0.000000e+00> : vector<16xf32>
    %121 = vector.multi_reduction <add>, %120, %cst_50 [1] : vector<16x16xf32> to vector<16xf32>
    %122 = vector.shape_cast %121 : vector<16xf32> to vector<16x1xf32>
    %123 = tpu.reciprocal %122 {approx = true} : vector<16x1xf32> -> vector<16x1xf32>
    %124 = vector.broadcast %123 : vector<16x1xf32> to vector<16x16xf32>
    %125 = arith.mulf %120, %124 : vector<16x16xf32>
    %cst_51 = arith.constant dense<0.000000e+00> : vector<16x8xf32>
    %126 = tpu.matmul %125, %112, %cst_51 {dimension_numbers = #tpu.dot_dimension_numbers<[1], [0], [0], [1], [0, 0, 1, 1], [], []>} : vector<16x16xf32>, vector<16x8xf32>, vector<16x8xf32> -> vector<16x8xf32>
    %c0_52 = arith.constant 0 : index
    %c3 = arith.constant 3 : index
    %c0_53 = arith.constant 0 : index
    %c0_54 = arith.constant 0 : index
    %127 = vector.load %arg9[%c0_52, %c3, %c0_53, %c0_54] : memref<2x4x8x32xbf16, #tpu.memory_space<vmem>>, vector<1x1x8x32xbf16>
    %128 = vector.shape_cast %127 : vector<1x1x8x32xbf16> to vector<8x32xbf16>
    %129 = arith.truncf %126 : vector<16x8xf32> to vector<16x8xbf16>
    %cst_55 = arith.constant dense<0.000000e+00> : vector<16x32xf32>
    %130 = tpu.matmul %129, %128, %cst_55 {dimension_numbers = #tpu.dot_dimension_numbers<[1], [0], [0], [1], [0, 0, 1, 1], [], []>} : vector<16x8xbf16>, vector<8x32xbf16>, vector<16x32xf32> -> vector<16x32xf32>
    %131 = arith.addf %109, %130 : vector<16x32xf32>
    %c0_56 = arith.constant 0 : index
    %c0_57 = arith.constant 0 : index
    %c0_58 = arith.constant 0 : index
    %132 = vector.load %arg10[%c0_56, %c0_57, %c0_58] : memref<2x1x32xf32, #tpu.memory_space<vmem>>, vector<1x1x32xf32>
    %133 = vector.shape_cast %132 : vector<1x1x32xf32> to vector<1x32xf32>
    %134 = vector.broadcast %133 : vector<1x32xf32> to vector<16x32xf32>
    %135 = arith.addf %131, %134 : vector<16x32xf32>
    %136 = arith.addf %30, %135 : vector<16x32xf32>
    %c0_59 = arith.constant 0 : index
    %c0_60 = arith.constant 0 : index
    %c0_61 = arith.constant 0 : index
    %137 = vector.load %arg11[%c0_59, %c0_60, %c0_61] : memref<2x1x32xf32, #tpu.memory_space<vmem>>, vector<1x1x32xf32>
    %138 = vector.shape_cast %137 : vector<1x1x32xf32> to vector<1x32xf32>
    %c0_62 = arith.constant 0 : index
    %c0_63 = arith.constant 0 : index
    %c0_64 = arith.constant 0 : index
    %139 = vector.load %arg12[%c0_62, %c0_63, %c0_64] : memref<2x1x32xf32, #tpu.memory_space<vmem>>, vector<1x1x32xf32>
    %140 = vector.shape_cast %139 : vector<1x1x32xf32> to vector<1x32xf32>
    %cst_65 = arith.constant dense<0.000000e+00> : vector<16xf32>
    %141 = vector.multi_reduction <add>, %136, %cst_65 [1] : vector<16x32xf32> to vector<16xf32>
    %142 = vector.shape_cast %141 : vector<16xf32> to vector<16x1xf32>
    %cst_66 = arith.constant 3.200000e+01 : f32
    %143 = vector.broadcast %cst_66 : f32 to vector<16x1xf32>
    %144 = arith.divf %142, %143 : vector<16x1xf32>
    %145 = vector.broadcast %144 : vector<16x1xf32> to vector<16x32xf32>
    %146 = arith.subf %136, %145 : vector<16x32xf32>
    %147 = arith.mulf %146, %146 : vector<16x32xf32>
    %cst_67 = arith.constant dense<0.000000e+00> : vector<16xf32>
    %148 = vector.multi_reduction <add>, %147, %cst_67 [1] : vector<16x32xf32> to vector<16xf32>
    %149 = vector.shape_cast %148 : vector<16xf32> to vector<16x1xf32>
    %cst_68 = arith.constant 3.200000e+01 : f32
    %150 = vector.broadcast %cst_68 : f32 to vector<16x1xf32>
    %151 = arith.divf %149, %150 : vector<16x1xf32>
    %152 = vector.broadcast %144 : vector<16x1xf32> to vector<16x32xf32>
    %153 = arith.subf %136, %152 : vector<16x32xf32>
    %cst_69 = arith.constant 9.99999996E-13 : f32
    %154 = vector.broadcast %cst_69 : f32 to vector<16x1xf32>
    %155 = arith.addf %151, %154 : vector<16x1xf32>
    %156 = math.rsqrt %155 : vector<16x1xf32>
    %157 = vector.broadcast %156 : vector<16x1xf32> to vector<16x32xf32>
    %158 = arith.mulf %153, %157 : vector<16x32xf32>
    %159 = vector.broadcast %138 : vector<1x32xf32> to vector<16x32xf32>
    %160 = arith.mulf %158, %159 : vector<16x32xf32>
    %161 = vector.broadcast %140 : vector<1x32xf32> to vector<16x32xf32>
    %162 = arith.addf %160, %161 : vector<16x32xf32>
    %c0_70 = arith.constant 0 : index
    %c0_71 = arith.constant 0 : index
    %c0_72 = arith.constant 0 : index
    %163 = vector.load %arg13[%c0_70, %c0_71, %c0_72] : memref<2x32x64xbf16, #tpu.memory_space<vmem>>, vector<1x32x64xbf16>
    %164 = vector.shape_cast %163 : vector<1x32x64xbf16> to vector<32x64xbf16>
    %165 = arith.truncf %162 : vector<16x32xf32> to vector<16x32xbf16>
    %cst_73 = arith.constant dense<0.000000e+00> : vector<16x64xf32>
    %166 = tpu.matmul %165, %164, %cst_73 {dimension_numbers = #tpu.dot_dimension_numbers<[1], [0], [0], [1], [0, 0, 1, 1], [], []>} : vector<16x32xbf16>, vector<32x64xbf16>, vector<16x64xf32> -> vector<16x64xf32>
    %c0_74 = arith.constant 0 : index
    %c0_75 = arith.constant 0 : index
    %c0_76 = arith.constant 0 : index
    %167 = vector.load %arg14[%c0_74, %c0_75, %c0_76] : memref<2x1x64xf32, #tpu.memory_space<vmem>>, vector<1x1x64xf32>
    %168 = vector.shape_cast %167 : vector<1x1x64xf32> to vector<1x64xf32>
    %169 = vector.broadcast %168 : vector<1x64xf32> to vector<16x64xf32>
    %170 = arith.addf %166, %169 : vector<16x64xf32>
    %171 = arith.mulf %170, %170 : vector<16x64xf32>
    %172 = arith.mulf %170, %171 : vector<16x64xf32>
    %cst_77 = arith.constant 4.471500e-02 : f32
    %173 = vector.broadcast %cst_77 : f32 to vector<16x64xf32>
    %174 = arith.mulf %173, %172 : vector<16x64xf32>
    %175 = arith.addf %170, %174 : vector<16x64xf32>
    %cst_78 = arith.constant 0.797884583 : f32
    %176 = vector.broadcast %cst_78 : f32 to vector<16x64xf32>
    %177 = arith.mulf %176, %175 : vector<16x64xf32>
    %178 = math.tanh %177 : vector<16x64xf32>
    %cst_79 = arith.constant 1.000000e+00 : f32
    %179 = vector.broadcast %cst_79 : f32 to vector<16x64xf32>
    %180 = arith.addf %179, %178 : vector<16x64xf32>
    %cst_80 = arith.constant 5.000000e-01 : f32
    %181 = vector.broadcast %cst_80 : f32 to vector<16x64xf32>
    %182 = arith.mulf %181, %180 : vector<16x64xf32>
    %183 = arith.mulf %170, %182 : vector<16x64xf32>
    %c0_81 = arith.constant 0 : index
    %c0_82 = arith.constant 0 : index
    %c0_83 = arith.constant 0 : index
    %184 = vector.load %arg15[%c0_81, %c0_82, %c0_83] : memref<2x64x32xbf16, #tpu.memory_space<vmem>>, vector<1x64x32xbf16>
    %185 = vector.shape_cast %184 : vector<1x64x32xbf16> to vector<64x32xbf16>
    %186 = arith.truncf %183 : vector<16x64xf32> to vector<16x64xbf16>
    %cst_84 = arith.constant dense<0.000000e+00> : vector<16x32xf32>
    %187 = tpu.matmul %186, %185, %cst_84 {dimension_numbers = #tpu.dot_dimension_numbers<[1], [0], [0], [1], [0, 0, 1, 1], [], []>} : vector<16x64xbf16>, vector<64x32xbf16>, vector<16x32xf32> -> vector<16x32xf32>
    %c0_85 = arith.constant 0 : index
    %c0_86 = arith.constant 0 : index
    %c0_87 = arith.constant 0 : index
    %188 = vector.load %arg16[%c0_85, %c0_86, %c0_87] : memref<2x1x32xf32, #tpu.memory_space<vmem>>, vector<1x1x32xf32>
    %189 = vector.shape_cast %188 : vector<1x1x32xf32> to vector<1x32xf32>
    %190 = vector.broadcast %189 : vector<1x32xf32> to vector<16x32xf32>
    %191 = arith.addf %187, %190 : vector<16x32xf32>
    %192 = arith.addf %162, %191 : vector<16x32xf32>
    %c0_88 = arith.constant 0 : index
    %c0_89 = arith.constant 0 : index
    %c0_90 = arith.constant 0 : index
    %193 = vector.load %arg17[%c0_88, %c0_89, %c0_90] : memref<2x1x32xf32, #tpu.memory_space<vmem>>, vector<1x1x32xf32>
    %194 = vector.shape_cast %193 : vector<1x1x32xf32> to vector<1x32xf32>
    %c0_91 = arith.constant 0 : index
    %c0_92 = arith.constant 0 : index
    %c0_93 = arith.constant 0 : index
    %195 = vector.load %arg18[%c0_91, %c0_92, %c0_93] : memref<2x1x32xf32, #tpu.memory_space<vmem>>, vector<1x1x32xf32>
    %196 = vector.shape_cast %195 : vector<1x1x32xf32> to vector<1x32xf32>
    %cst_94 = arith.constant dense<0.000000e+00> : vector<16xf32>
    %197 = vector.multi_reduction <add>, %192, %cst_94 [1] : vector<16x32xf32> to vector<16xf32>
    %198 = vector.shape_cast %197 : vector<16xf32> to vector<16x1xf32>
    %cst_95 = arith.constant 3.200000e+01 : f32
    %199 = vector.broadcast %cst_95 : f32 to vector<16x1xf32>
    %200 = arith.divf %198, %199 : vector<16x1xf32>
    %201 = vector.broadcast %200 : vector<16x1xf32> to vector<16x32xf32>
    %202 = arith.subf %192, %201 : vector<16x32xf32>
    %203 = arith.mulf %202, %202 : vector<16x32xf32>
    %cst_96 = arith.constant dense<0.000000e+00> : vector<16xf32>
    %204 = vector.multi_reduction <add>, %203, %cst_96 [1] : vector<16x32xf32> to vector<16xf32>
    %205 = vector.shape_cast %204 : vector<16xf32> to vector<16x1xf32>
    %cst_97 = arith.constant 3.200000e+01 : f32
    %206 = vector.broadcast %cst_97 : f32 to vector<16x1xf32>
    %207 = arith.divf %205, %206 : vector<16x1xf32>
    %208 = vector.broadcast %200 : vector<16x1xf32> to vector<16x32xf32>
    %209 = arith.subf %192, %208 : vector<16x32xf32>
    %cst_98 = arith.constant 9.99999996E-13 : f32
    %210 = vector.broadcast %cst_98 : f32 to vector<16x1xf32>
    %211 = arith.addf %207, %210 : vector<16x1xf32>
    %212 = math.rsqrt %211 : vector<16x1xf32>
    %213 = vector.broadcast %212 : vector<16x1xf32> to vector<16x32xf32>
    %214 = arith.mulf %209, %213 : vector<16x32xf32>
    %215 = vector.broadcast %194 : vector<1x32xf32> to vector<16x32xf32>
    %216 = arith.mulf %214, %215 : vector<16x32xf32>
    %217 = vector.broadcast %196 : vector<1x32xf32> to vector<16x32xf32>
    %218 = arith.addf %216, %217 : vector<16x32xf32>
    %c1_99 = arith.constant 1 : index
    %c0_100 = arith.constant 0 : index
    %c0_101 = arith.constant 0 : index
    %219 = vector.load %arg7[%c1_99, %c0_100, %c0_101] : memref<2x32x96xbf16, #tpu.memory_space<vmem>>, vector<1x32x96xbf16>
    %220 = vector.shape_cast %219 : vector<1x32x96xbf16> to vector<32x96xbf16>
    %221 = arith.truncf %218 : vector<16x32xf32> to vector<16x32xbf16>
    %cst_102 = arith.constant dense<0.000000e+00> : vector<16x96xf32>
    %222 = tpu.matmul %221, %220, %cst_102 {dimension_numbers = #tpu.dot_dimension_numbers<[1], [0], [0], [1], [0, 0, 1, 1], [], []>} : vector<16x32xbf16>, vector<32x96xbf16>, vector<16x96xf32> -> vector<16x96xf32>
    %c1_103 = arith.constant 1 : index
    %c0_104 = arith.constant 0 : index
    %c0_105 = arith.constant 0 : index
    %223 = vector.load %arg8[%c1_103, %c0_104, %c0_105] : memref<2x1x96xf32, #tpu.memory_space<vmem>>, vector<1x1x96xf32>
    %224 = vector.shape_cast %223 : vector<1x1x96xf32> to vector<1x96xf32>
    %225 = vector.broadcast %224 : vector<1x96xf32> to vector<16x96xf32>
    %226 = arith.addf %222, %225 : vector<16x96xf32>
    %227 = vector.extract_strided_slice %226 {offsets = [0, 0], sizes = [16, 32], strides = [1, 1]} : vector<16x96xf32> to vector<16x32xf32>
    %228 = vector.extract_strided_slice %226 {offsets = [0, 32], sizes = [16, 32], strides = [1, 1]} : vector<16x96xf32> to vector<16x32xf32>
    %229 = vector.extract_strided_slice %226 {offsets = [0, 64], sizes = [16, 32], strides = [1, 1]} : vector<16x96xf32> to vector<16x32xf32>
    %cst_106 = arith.constant 0.000000e+00 : f32
    %230 = vector.broadcast %cst_106 : f32 to vector<16x32xf32>
    %231 = vector.extract_strided_slice %227 {offsets = [0, 0], sizes = [16, 8], strides = [1, 1]} : vector<16x32xf32> to vector<16x8xf32>
    %232 = vector.extract_strided_slice %228 {offsets = [0, 0], sizes = [16, 8], strides = [1, 1]} : vector<16x32xf32> to vector<16x8xf32>
    %233 = vector.extract_strided_slice %229 {offsets = [0, 0], sizes = [16, 8], strides = [1, 1]} : vector<16x32xf32> to vector<16x8xf32>
    %234 = tpu.transpose %232, [1, 0] : vector<16x8xf32> -> vector<8x16xf32>
    %cst_107 = arith.constant dense<0.000000e+00> : vector<16x16xf32>
    %235 = tpu.matmul %231, %234, %cst_107 {dimension_numbers = #tpu.dot_dimension_numbers<[1], [0], [0], [1], [0, 0, 1, 1], [], []>} : vector<16x8xf32>, vector<8x16xf32>, vector<16x16xf32> -> vector<16x16xf32>
    %236 = arith.addf %235, %31 : vector<16x16xf32>
    %cst_108 = arith.constant dense<0xFF800000> : vector<16xf32>
    %237 = vector.multi_reduction <maximumf>, %236, %cst_108 [1] : vector<16x16xf32> to vector<16xf32>
    %238 = vector.shape_cast %237 : vector<16xf32> to vector<16x1xf32>
    %239 = vector.broadcast %238 : vector<16x1xf32> to vector<16x16xf32>
    %240 = arith.subf %236, %239 : vector<16x16xf32>
    %241 = math.exp %240 : vector<16x16xf32>
    %cst_109 = arith.constant dense<0.000000e+00> : vector<16xf32>
    %242 = vector.multi_reduction <add>, %241, %cst_109 [1] : vector<16x16xf32> to vector<16xf32>
    %243 = vector.shape_cast %242 : vector<16xf32> to vector<16x1xf32>
    %244 = tpu.reciprocal %243 {approx = true} : vector<16x1xf32> -> vector<16x1xf32>
    %245 = vector.broadcast %244 : vector<16x1xf32> to vector<16x16xf32>
    %246 = arith.mulf %241, %245 : vector<16x16xf32>
    %cst_110 = arith.constant dense<0.000000e+00> : vector<16x8xf32>
    %247 = tpu.matmul %246, %233, %cst_110 {dimension_numbers = #tpu.dot_dimension_numbers<[1], [0], [0], [1], [0, 0, 1, 1], [], []>} : vector<16x16xf32>, vector<16x8xf32>, vector<16x8xf32> -> vector<16x8xf32>
    %c1_111 = arith.constant 1 : index
    %c0_112 = arith.constant 0 : index
    %c0_113 = arith.constant 0 : index
    %c0_114 = arith.constant 0 : index
    %248 = vector.load %arg9[%c1_111, %c0_112, %c0_113, %c0_114] : memref<2x4x8x32xbf16, #tpu.memory_space<vmem>>, vector<1x1x8x32xbf16>
    %249 = vector.shape_cast %248 : vector<1x1x8x32xbf16> to vector<8x32xbf16>
    %250 = arith.truncf %247 : vector<16x8xf32> to vector<16x8xbf16>
    %cst_115 = arith.constant dense<0.000000e+00> : vector<16x32xf32>
    %251 = tpu.matmul %250, %249, %cst_115 {dimension_numbers = #tpu.dot_dimension_numbers<[1], [0], [0], [1], [0, 0, 1, 1], [], []>} : vector<16x8xbf16>, vector<8x32xbf16>, vector<16x32xf32> -> vector<16x32xf32>
    %252 = arith.addf %230, %251 : vector<16x32xf32>
    %253 = vector.extract_strided_slice %227 {offsets = [0, 8], sizes = [16, 8], strides = [1, 1]} : vector<16x32xf32> to vector<16x8xf32>
    %254 = vector.extract_strided_slice %228 {offsets = [0, 8], sizes = [16, 8], strides = [1, 1]} : vector<16x32xf32> to vector<16x8xf32>
    %255 = vector.extract_strided_slice %229 {offsets = [0, 8], sizes = [16, 8], strides = [1, 1]} : vector<16x32xf32> to vector<16x8xf32>
    %256 = tpu.transpose %254, [1, 0] : vector<16x8xf32> -> vector<8x16xf32>
    %cst_116 = arith.constant dense<0.000000e+00> : vector<16x16xf32>
    %257 = tpu.matmul %253, %256, %cst_116 {dimension_numbers = #tpu.dot_dimension_numbers<[1], [0], [0], [1], [0, 0, 1, 1], [], []>} : vector<16x8xf32>, vector<8x16xf32>, vector<16x16xf32> -> vector<16x16xf32>
    %258 = arith.addf %257, %31 : vector<16x16xf32>
    %cst_117 = arith.constant dense<0xFF800000> : vector<16xf32>
    %259 = vector.multi_reduction <maximumf>, %258, %cst_117 [1] : vector<16x16xf32> to vector<16xf32>
    %260 = vector.shape_cast %259 : vector<16xf32> to vector<16x1xf32>
    %261 = vector.broadcast %260 : vector<16x1xf32> to vector<16x16xf32>
    %262 = arith.subf %258, %261 : vector<16x16xf32>
    %263 = math.exp %262 : vector<16x16xf32>
    %cst_118 = arith.constant dense<0.000000e+00> : vector<16xf32>
    %264 = vector.multi_reduction <add>, %263, %cst_118 [1] : vector<16x16xf32> to vector<16xf32>
    %265 = vector.shape_cast %264 : vector<16xf32> to vector<16x1xf32>
    %266 = tpu.reciprocal %265 {approx = true} : vector<16x1xf32> -> vector<16x1xf32>
    %267 = vector.broadcast %266 : vector<16x1xf32> to vector<16x16xf32>
    %268 = arith.mulf %263, %267 : vector<16x16xf32>
    %cst_119 = arith.constant dense<0.000000e+00> : vector<16x8xf32>
    %269 = tpu.matmul %268, %255, %cst_119 {dimension_numbers = #tpu.dot_dimension_numbers<[1], [0], [0], [1], [0, 0, 1, 1], [], []>} : vector<16x16xf32>, vector<16x8xf32>, vector<16x8xf32> -> vector<16x8xf32>
    %c1_120 = arith.constant 1 : index
    %c1_121 = arith.constant 1 : index
    %c0_122 = arith.constant 0 : index
    %c0_123 = arith.constant 0 : index
    %270 = vector.load %arg9[%c1_120, %c1_121, %c0_122, %c0_123] : memref<2x4x8x32xbf16, #tpu.memory_space<vmem>>, vector<1x1x8x32xbf16>
    %271 = vector.shape_cast %270 : vector<1x1x8x32xbf16> to vector<8x32xbf16>
    %272 = arith.truncf %269 : vector<16x8xf32> to vector<16x8xbf16>
    %cst_124 = arith.constant dense<0.000000e+00> : vector<16x32xf32>
    %273 = tpu.matmul %272, %271, %cst_124 {dimension_numbers = #tpu.dot_dimension_numbers<[1], [0], [0], [1], [0, 0, 1, 1], [], []>} : vector<16x8xbf16>, vector<8x32xbf16>, vector<16x32xf32> -> vector<16x32xf32>
    %274 = arith.addf %252, %273 : vector<16x32xf32>
    %275 = vector.extract_strided_slice %227 {offsets = [0, 16], sizes = [16, 8], strides = [1, 1]} : vector<16x32xf32> to vector<16x8xf32>
    %276 = vector.extract_strided_slice %228 {offsets = [0, 16], sizes = [16, 8], strides = [1, 1]} : vector<16x32xf32> to vector<16x8xf32>
    %277 = vector.extract_strided_slice %229 {offsets = [0, 16], sizes = [16, 8], strides = [1, 1]} : vector<16x32xf32> to vector<16x8xf32>
    %278 = tpu.transpose %276, [1, 0] : vector<16x8xf32> -> vector<8x16xf32>
    %cst_125 = arith.constant dense<0.000000e+00> : vector<16x16xf32>
    %279 = tpu.matmul %275, %278, %cst_125 {dimension_numbers = #tpu.dot_dimension_numbers<[1], [0], [0], [1], [0, 0, 1, 1], [], []>} : vector<16x8xf32>, vector<8x16xf32>, vector<16x16xf32> -> vector<16x16xf32>
    %280 = arith.addf %279, %31 : vector<16x16xf32>
    %cst_126 = arith.constant dense<0xFF800000> : vector<16xf32>
    %281 = vector.multi_reduction <maximumf>, %280, %cst_126 [1] : vector<16x16xf32> to vector<16xf32>
    %282 = vector.shape_cast %281 : vector<16xf32> to vector<16x1xf32>
    %283 = vector.broadcast %282 : vector<16x1xf32> to vector<16x16xf32>
    %284 = arith.subf %280, %283 : vector<16x16xf32>
    %285 = math.exp %284 : vector<16x16xf32>
    %cst_127 = arith.constant dense<0.000000e+00> : vector<16xf32>
    %286 = vector.multi_reduction <add>, %285, %cst_127 [1] : vector<16x16xf32> to vector<16xf32>
    %287 = vector.shape_cast %286 : vector<16xf32> to vector<16x1xf32>
    %288 = tpu.reciprocal %287 {approx = true} : vector<16x1xf32> -> vector<16x1xf32>
    %289 = vector.broadcast %288 : vector<16x1xf32> to vector<16x16xf32>
    %290 = arith.mulf %285, %289 : vector<16x16xf32>
    %cst_128 = arith.constant dense<0.000000e+00> : vector<16x8xf32>
    %291 = tpu.matmul %290, %277, %cst_128 {dimension_numbers = #tpu.dot_dimension_numbers<[1], [0], [0], [1], [0, 0, 1, 1], [], []>} : vector<16x16xf32>, vector<16x8xf32>, vector<16x8xf32> -> vector<16x8xf32>
    %c1_129 = arith.constant 1 : index
    %c2_130 = arith.constant 2 : index
    %c0_131 = arith.constant 0 : index
    %c0_132 = arith.constant 0 : index
    %292 = vector.load %arg9[%c1_129, %c2_130, %c0_131, %c0_132] : memref<2x4x8x32xbf16, #tpu.memory_space<vmem>>, vector<1x1x8x32xbf16>
    %293 = vector.shape_cast %292 : vector<1x1x8x32xbf16> to vector<8x32xbf16>
    %294 = arith.truncf %291 : vector<16x8xf32> to vector<16x8xbf16>
    %cst_133 = arith.constant dense<0.000000e+00> : vector<16x32xf32>
    %295 = tpu.matmul %294, %293, %cst_133 {dimension_numbers = #tpu.dot_dimension_numbers<[1], [0], [0], [1], [0, 0, 1, 1], [], []>} : vector<16x8xbf16>, vector<8x32xbf16>, vector<16x32xf32> -> vector<16x32xf32>
    %296 = arith.addf %274, %295 : vector<16x32xf32>
    %297 = vector.extract_strided_slice %227 {offsets = [0, 24], sizes = [16, 8], strides = [1, 1]} : vector<16x32xf32> to vector<16x8xf32>
    %298 = vector.extract_strided_slice %228 {offsets = [0, 24], sizes = [16, 8], strides = [1, 1]} : vector<16x32xf32> to vector<16x8xf32>
    %299 = vector.extract_strided_slice %229 {offsets = [0, 24], sizes = [16, 8], strides = [1, 1]} : vector<16x32xf32> to vector<16x8xf32>
    %300 = tpu.transpose %298, [1, 0] : vector<16x8xf32> -> vector<8x16xf32>
    %cst_134 = arith.constant dense<0.000000e+00> : vector<16x16xf32>
    %301 = tpu.matmul %297, %300, %cst_134 {dimension_numbers = #tpu.dot_dimension_numbers<[1], [0], [0], [1], [0, 0, 1, 1], [], []>} : vector<16x8xf32>, vector<8x16xf32>, vector<16x16xf32> -> vector<16x16xf32>
    %302 = arith.addf %301, %31 : vector<16x16xf32>
    %cst_135 = arith.constant dense<0xFF800000> : vector<16xf32>
    %303 = vector.multi_reduction <maximumf>, %302, %cst_135 [1] : vector<16x16xf32> to vector<16xf32>
    %304 = vector.shape_cast %303 : vector<16xf32> to vector<16x1xf32>
    %305 = vector.broadcast %304 : vector<16x1xf32> to vector<16x16xf32>
    %306 = arith.subf %302, %305 : vector<16x16xf32>
    %307 = math.exp %306 : vector<16x16xf32>
    %cst_136 = arith.constant dense<0.000000e+00> : vector<16xf32>
    %308 = vector.multi_reduction <add>, %307, %cst_136 [1] : vector<16x16xf32> to vector<16xf32>
    %309 = vector.shape_cast %308 : vector<16xf32> to vector<16x1xf32>
    %310 = tpu.reciprocal %309 {approx = true} : vector<16x1xf32> -> vector<16x1xf32>
    %311 = vector.broadcast %310 : vector<16x1xf32> to vector<16x16xf32>
    %312 = arith.mulf %307, %311 : vector<16x16xf32>
    %cst_137 = arith.constant dense<0.000000e+00> : vector<16x8xf32>
    %313 = tpu.matmul %312, %299, %cst_137 {dimension_numbers = #tpu.dot_dimension_numbers<[1], [0], [0], [1], [0, 0, 1, 1], [], []>} : vector<16x16xf32>, vector<16x8xf32>, vector<16x8xf32> -> vector<16x8xf32>
    %c1_138 = arith.constant 1 : index
    %c3_139 = arith.constant 3 : index
    %c0_140 = arith.constant 0 : index
    %c0_141 = arith.constant 0 : index
    %314 = vector.load %arg9[%c1_138, %c3_139, %c0_140, %c0_141] : memref<2x4x8x32xbf16, #tpu.memory_space<vmem>>, vector<1x1x8x32xbf16>
    %315 = vector.shape_cast %314 : vector<1x1x8x32xbf16> to vector<8x32xbf16>
    %316 = arith.truncf %313 : vector<16x8xf32> to vector<16x8xbf16>
    %cst_142 = arith.constant dense<0.000000e+00> : vector<16x32xf32>
    %317 = tpu.matmul %316, %315, %cst_142 {dimension_numbers = #tpu.dot_dimension_numbers<[1], [0], [0], [1], [0, 0, 1, 1], [], []>} : vector<16x8xbf16>, vector<8x32xbf16>, vector<16x32xf32> -> vector<16x32xf32>
    %318 = arith.addf %296, %317 : vector<16x32xf32>
    %c1_143 = arith.constant 1 : index
    %c0_144 = arith.constant 0 : index
    %c0_145 = arith.constant 0 : index
    %319 = vector.load %arg10[%c1_143, %c0_144, %c0_145] : memref<2x1x32xf32, #tpu.memory_space<vmem>>, vector<1x1x32xf32>
    %320 = vector.shape_cast %319 : vector<1x1x32xf32> to vector<1x32xf32>
    %321 = vector.broadcast %320 : vector<1x32xf32> to vector<16x32xf32>
    %322 = arith.addf %318, %321 : vector<16x32xf32>
    %323 = arith.addf %218, %322 : vector<16x32xf32>
    %c1_146 = arith.constant 1 : index
    %c0_147 = arith.constant 0 : index
    %c0_148 = arith.constant 0 : index
    %324 = vector.load %arg11[%c1_146, %c0_147, %c0_148] : memref<2x1x32xf32, #tpu.memory_space<vmem>>, vector<1x1x32xf32>
    %325 = vector.shape_cast %324 : vector<1x1x32xf32> to vector<1x32xf32>
    %c1_149 = arith.constant 1 : index
    %c0_150 = arith.constant 0 : index
    %c0_151 = arith.constant 0 : index
    %326 = vector.load %arg12[%c1_149, %c0_150, %c0_151] : memref<2x1x32xf32, #tpu.memory_space<vmem>>, vector<1x1x32xf32>
    %327 = vector.shape_cast %326 : vector<1x1x32xf32> to vector<1x32xf32>
    %cst_152 = arith.constant dense<0.000000e+00> : vector<16xf32>
    %328 = vector.multi_reduction <add>, %323, %cst_152 [1] : vector<16x32xf32> to vector<16xf32>
    %329 = vector.shape_cast %328 : vector<16xf32> to vector<16x1xf32>
    %cst_153 = arith.constant 3.200000e+01 : f32
    %330 = vector.broadcast %cst_153 : f32 to vector<16x1xf32>
    %331 = arith.divf %329, %330 : vector<16x1xf32>
    %332 = vector.broadcast %331 : vector<16x1xf32> to vector<16x32xf32>
    %333 = arith.subf %323, %332 : vector<16x32xf32>
    %334 = arith.mulf %333, %333 : vector<16x32xf32>
    %cst_154 = arith.constant dense<0.000000e+00> : vector<16xf32>
    %335 = vector.multi_reduction <add>, %334, %cst_154 [1] : vector<16x32xf32> to vector<16xf32>
    %336 = vector.shape_cast %335 : vector<16xf32> to vector<16x1xf32>
    %cst_155 = arith.constant 3.200000e+01 : f32
    %337 = vector.broadcast %cst_155 : f32 to vector<16x1xf32>
    %338 = arith.divf %336, %337 : vector<16x1xf32>
    %339 = vector.broadcast %331 : vector<16x1xf32> to vector<16x32xf32>
    %340 = arith.subf %323, %339 : vector<16x32xf32>
    %cst_156 = arith.constant 9.99999996E-13 : f32
    %341 = vector.broadcast %cst_156 : f32 to vector<16x1xf32>
    %342 = arith.addf %338, %341 : vector<16x1xf32>
    %343 = math.rsqrt %342 : vector<16x1xf32>
    %344 = vector.broadcast %343 : vector<16x1xf32> to vector<16x32xf32>
    %345 = arith.mulf %340, %344 : vector<16x32xf32>
    %346 = vector.broadcast %325 : vector<1x32xf32> to vector<16x32xf32>
    %347 = arith.mulf %345, %346 : vector<16x32xf32>
    %348 = vector.broadcast %327 : vector<1x32xf32> to vector<16x32xf32>
    %349 = arith.addf %347, %348 : vector<16x32xf32>
    %c1_157 = arith.constant 1 : index
    %c0_158 = arith.constant 0 : index
    %c0_159 = arith.constant 0 : index
    %350 = vector.load %arg13[%c1_157, %c0_158, %c0_159] : memref<2x32x64xbf16, #tpu.memory_space<vmem>>, vector<1x32x64xbf16>
    %351 = vector.shape_cast %350 : vector<1x32x64xbf16> to vector<32x64xbf16>
    %352 = arith.truncf %349 : vector<16x32xf32> to vector<16x32xbf16>
    %cst_160 = arith.constant dense<0.000000e+00> : vector<16x64xf32>
    %353 = tpu.matmul %352, %351, %cst_160 {dimension_numbers = #tpu.dot_dimension_numbers<[1], [0], [0], [1], [0, 0, 1, 1], [], []>} : vector<16x32xbf16>, vector<32x64xbf16>, vector<16x64xf32> -> vector<16x64xf32>
    %c1_161 = arith.constant 1 : index
    %c0_162 = arith.constant 0 : index
    %c0_163 = arith.constant 0 : index
    %354 = vector.load %arg14[%c1_161, %c0_162, %c0_163] : memref<2x1x64xf32, #tpu.memory_space<vmem>>, vector<1x1x64xf32>
    %355 = vector.shape_cast %354 : vector<1x1x64xf32> to vector<1x64xf32>
    %356 = vector.broadcast %355 : vector<1x64xf32> to vector<16x64xf32>
    %357 = arith.addf %353, %356 : vector<16x64xf32>
    %358 = arith.mulf %357, %357 : vector<16x64xf32>
    %359 = arith.mulf %357, %358 : vector<16x64xf32>
    %cst_164 = arith.constant 4.471500e-02 : f32
    %360 = vector.broadcast %cst_164 : f32 to vector<16x64xf32>
    %361 = arith.mulf %360, %359 : vector<16x64xf32>
    %362 = arith.addf %357, %361 : vector<16x64xf32>
    %cst_165 = arith.constant 0.797884583 : f32
    %363 = vector.broadcast %cst_165 : f32 to vector<16x64xf32>
    %364 = arith.mulf %363, %362 : vector<16x64xf32>
    %365 = math.tanh %364 : vector<16x64xf32>
    %cst_166 = arith.constant 1.000000e+00 : f32
    %366 = vector.broadcast %cst_166 : f32 to vector<16x64xf32>
    %367 = arith.addf %366, %365 : vector<16x64xf32>
    %cst_167 = arith.constant 5.000000e-01 : f32
    %368 = vector.broadcast %cst_167 : f32 to vector<16x64xf32>
    %369 = arith.mulf %368, %367 : vector<16x64xf32>
    %370 = arith.mulf %357, %369 : vector<16x64xf32>
    %c1_168 = arith.constant 1 : index
    %c0_169 = arith.constant 0 : index
    %c0_170 = arith.constant 0 : index
    %371 = vector.load %arg15[%c1_168, %c0_169, %c0_170] : memref<2x64x32xbf16, #tpu.memory_space<vmem>>, vector<1x64x32xbf16>
    %372 = vector.shape_cast %371 : vector<1x64x32xbf16> to vector<64x32xbf16>
    %373 = arith.truncf %370 : vector<16x64xf32> to vector<16x64xbf16>
    %cst_171 = arith.constant dense<0.000000e+00> : vector<16x32xf32>
    %374 = tpu.matmul %373, %372, %cst_171 {dimension_numbers = #tpu.dot_dimension_numbers<[1], [0], [0], [1], [0, 0, 1, 1], [], []>} : vector<16x64xbf16>, vector<64x32xbf16>, vector<16x32xf32> -> vector<16x32xf32>
    %c1_172 = arith.constant 1 : index
    %c0_173 = arith.constant 0 : index
    %c0_174 = arith.constant 0 : index
    %375 = vector.load %arg16[%c1_172, %c0_173, %c0_174] : memref<2x1x32xf32, #tpu.memory_space<vmem>>, vector<1x1x32xf32>
    %376 = vector.shape_cast %375 : vector<1x1x32xf32> to vector<1x32xf32>
    %377 = vector.broadcast %376 : vector<1x32xf32> to vector<16x32xf32>
    %378 = arith.addf %374, %377 : vector<16x32xf32>
    %379 = arith.addf %349, %378 : vector<16x32xf32>
    %c1_175 = arith.constant 1 : index
    %c0_176 = arith.constant 0 : index
    %c0_177 = arith.constant 0 : index
    %380 = vector.load %arg17[%c1_175, %c0_176, %c0_177] : memref<2x1x32xf32, #tpu.memory_space<vmem>>, vector<1x1x32xf32>
    %381 = vector.shape_cast %380 : vector<1x1x32xf32> to vector<1x32xf32>
    %c1_178 = arith.constant 1 : index
    %c0_179 = arith.constant 0 : index
    %c0_180 = arith.constant 0 : index
    %382 = vector.load %arg18[%c1_178, %c0_179, %c0_180] : memref<2x1x32xf32, #tpu.memory_space<vmem>>, vector<1x1x32xf32>
    %383 = vector.shape_cast %382 : vector<1x1x32xf32> to vector<1x32xf32>
    %cst_181 = arith.constant dense<0.000000e+00> : vector<16xf32>
    %384 = vector.multi_reduction <add>, %379, %cst_181 [1] : vector<16x32xf32> to vector<16xf32>
    %385 = vector.shape_cast %384 : vector<16xf32> to vector<16x1xf32>
    %cst_182 = arith.constant 3.200000e+01 : f32
    %386 = vector.broadcast %cst_182 : f32 to vector<16x1xf32>
    %387 = arith.divf %385, %386 : vector<16x1xf32>
    %388 = vector.broadcast %387 : vector<16x1xf32> to vector<16x32xf32>
    %389 = arith.subf %379, %388 : vector<16x32xf32>
    %390 = arith.mulf %389, %389 : vector<16x32xf32>
    %cst_183 = arith.constant dense<0.000000e+00> : vector<16xf32>
    %391 = vector.multi_reduction <add>, %390, %cst_183 [1] : vector<16x32xf32> to vector<16xf32>
    %392 = vector.shape_cast %391 : vector<16xf32> to vector<16x1xf32>
    %cst_184 = arith.constant 3.200000e+01 : f32
    %393 = vector.broadcast %cst_184 : f32 to vector<16x1xf32>
    %394 = arith.divf %392, %393 : vector<16x1xf32>
    %395 = vector.broadcast %387 : vector<16x1xf32> to vector<16x32xf32>
    %396 = arith.subf %379, %395 : vector<16x32xf32>
    %cst_185 = arith.constant 9.99999996E-13 : f32
    %397 = vector.broadcast %cst_185 : f32 to vector<16x1xf32>
    %398 = arith.addf %394, %397 : vector<16x1xf32>
    %399 = math.rsqrt %398 : vector<16x1xf32>
    %400 = vector.broadcast %399 : vector<16x1xf32> to vector<16x32xf32>
    %401 = arith.mulf %396, %400 : vector<16x32xf32>
    %402 = vector.broadcast %381 : vector<1x32xf32> to vector<16x32xf32>
    %403 = arith.mulf %401, %402 : vector<16x32xf32>
    %404 = vector.broadcast %383 : vector<1x32xf32> to vector<16x32xf32>
    %405 = arith.addf %403, %404 : vector<16x32xf32>
    %c0_186 = arith.constant 0 : index
    %c0_187 = arith.constant 0 : index
    %406 = vector.load %arg19[%c0_186, %c0_187] : memref<32x32xbf16, #tpu.memory_space<vmem>>, vector<32x32xbf16>
    %407 = arith.truncf %405 : vector<16x32xf32> to vector<16x32xbf16>
    %cst_188 = arith.constant dense<0.000000e+00> : vector<16x32xf32>
    %408 = tpu.matmul %407, %406, %cst_188 {dimension_numbers = #tpu.dot_dimension_numbers<[1], [0], [0], [1], [0, 0, 1, 1], [], []>} : vector<16x32xbf16>, vector<32x32xbf16>, vector<16x32xf32> -> vector<16x32xf32>
    %c0_189 = arith.constant 0 : index
    %c0_190 = arith.constant 0 : index
    %409 = vector.load %arg20[%c0_189, %c0_190] : memref<1x32xf32, #tpu.memory_space<vmem>>, vector<1x32xf32>
    %410 = vector.broadcast %409 : vector<1x32xf32> to vector<16x32xf32>
    %411 = arith.addf %408, %410 : vector<16x32xf32>
    %412 = arith.mulf %411, %411 : vector<16x32xf32>
    %413 = arith.mulf %411, %412 : vector<16x32xf32>
    %cst_191 = arith.constant 4.471500e-02 : f32
    %414 = vector.broadcast %cst_191 : f32 to vector<16x32xf32>
    %415 = arith.mulf %414, %413 : vector<16x32xf32>
    %416 = arith.addf %411, %415 : vector<16x32xf32>
    %cst_192 = arith.constant 0.797884583 : f32
    %417 = vector.broadcast %cst_192 : f32 to vector<16x32xf32>
    %418 = arith.mulf %417, %416 : vector<16x32xf32>
    %419 = math.tanh %418 : vector<16x32xf32>
    %cst_193 = arith.constant 1.000000e+00 : f32
    %420 = vector.broadcast %cst_193 : f32 to vector<16x32xf32>
    %421 = arith.addf %420, %419 : vector<16x32xf32>
    %cst_194 = arith.constant 5.000000e-01 : f32
    %422 = vector.broadcast %cst_194 : f32 to vector<16x32xf32>
    %423 = arith.mulf %422, %421 : vector<16x32xf32>
    %424 = arith.mulf %411, %423 : vector<16x32xf32>
    %c0_195 = arith.constant 0 : index
    %c0_196 = arith.constant 0 : index
    %425 = vector.load %arg21[%c0_195, %c0_196] : memref<1x32xf32, #tpu.memory_space<vmem>>, vector<1x32xf32>
    %c0_197 = arith.constant 0 : index
    %c0_198 = arith.constant 0 : index
    %426 = vector.load %arg22[%c0_197, %c0_198] : memref<1x32xf32, #tpu.memory_space<vmem>>, vector<1x32xf32>
    %cst_199 = arith.constant dense<0.000000e+00> : vector<16xf32>
    %427 = vector.multi_reduction <add>, %424, %cst_199 [1] : vector<16x32xf32> to vector<16xf32>
    %428 = vector.shape_cast %427 : vector<16xf32> to vector<16x1xf32>
    %cst_200 = arith.constant 3.200000e+01 : f32
    %429 = vector.broadcast %cst_200 : f32 to vector<16x1xf32>
    %430 = arith.divf %428, %429 : vector<16x1xf32>
    %431 = vector.broadcast %430 : vector<16x1xf32> to vector<16x32xf32>
    %432 = arith.subf %424, %431 : vector<16x32xf32>
    %433 = arith.mulf %432, %432 : vector<16x32xf32>
    %cst_201 = arith.constant dense<0.000000e+00> : vector<16xf32>
    %434 = vector.multi_reduction <add>, %433, %cst_201 [1] : vector<16x32xf32> to vector<16xf32>
    %435 = vector.shape_cast %434 : vector<16xf32> to vector<16x1xf32>
    %cst_202 = arith.constant 3.200000e+01 : f32
    %436 = vector.broadcast %cst_202 : f32 to vector<16x1xf32>
    %437 = arith.divf %435, %436 : vector<16x1xf32>
    %438 = vector.broadcast %430 : vector<16x1xf32> to vector<16x32xf32>
    %439 = arith.subf %424, %438 : vector<16x32xf32>
    %cst_203 = arith.constant 9.99999996E-13 : f32
    %440 = vector.broadcast %cst_203 : f32 to vector<16x1xf32>
    %441 = arith.addf %437, %440 : vector<16x1xf32>
    %442 = math.rsqrt %441 : vector<16x1xf32>
    %443 = vector.broadcast %442 : vector<16x1xf32> to vector<16x32xf32>
    %444 = arith.mulf %439, %443 : vector<16x32xf32>
    %445 = vector.broadcast %425 : vector<1x32xf32> to vector<16x32xf32>
    %446 = arith.mulf %444, %445 : vector<16x32xf32>
    %447 = vector.broadcast %426 : vector<1x32xf32> to vector<16x32xf32>
    %448 = arith.addf %446, %447 : vector<16x32xf32>
    %c0_204 = arith.constant 0 : index
    %c0_205 = arith.constant 0 : index
    %449 = vector.load %arg23[%c0_204, %c0_205] : memref<32x50xbf16, #tpu.memory_space<vmem>>, vector<32x50xbf16>
    %450 = arith.truncf %448 : vector<16x32xf32> to vector<16x32xbf16>
    %cst_206 = arith.constant dense<0.000000e+00> : vector<16x50xf32>
    %451 = tpu.matmul %450, %449, %cst_206 {dimension_numbers = #tpu.dot_dimension_numbers<[1], [0], [0], [1], [0, 0, 1, 1], [], []>} : vector<16x32xbf16>, vector<32x50xbf16>, vector<16x50xf32> -> vector<16x50xf32>
    %c0_207 = arith.constant 0 : index
    %c0_208 = arith.constant 0 : index
    %452 = vector.load %arg24[%c0_207, %c0_208] : memref<1x50xf32, #tpu.memory_space<vmem>>, vector<1x50xf32>
    %453 = vector.broadcast %452 : vector<1x50xf32> to vector<16x50xf32>
    %454 = arith.addf %451, %453 : vector<16x50xf32>
    %c0_209 = arith.constant 0 : index
    %c0_210 = arith.constant 0 : index
    %455 = vector.load %arg25[%c0_209, %c0_210] : memref<16x50xf32, #tpu.memory_space<vmem>>, vector<16x50xf32>
    tpu.vector_store %arg25[%c0_209, %c0_210], %454 {strides = array<i32>} : memref<16x50xf32, #tpu.memory_space<vmem>>, vector<16x50xf32>,
    %cst_211 = arith.constant dense<0xFF800000> : vector<16xf32>
    %456 = vector.multi_reduction <maximumf>, %454, %cst_211 [1] : vector<16x50xf32> to vector<16xf32>
    %457 = vector.shape_cast %456 : vector<16xf32> to vector<16x1xf32>
    %458 = vector.broadcast %457 : vector<16x1xf32> to vector<16x50xf32>
    %459 = arith.subf %454, %458 : vector<16x50xf32>
    %460 = math.exp %459 : vector<16x50xf32>
    %cst_212 = arith.constant dense<0.000000e+00> : vector<16xf32>
    %461 = vector.multi_reduction <add>, %460, %cst_212 [1] : vector<16x50xf32> to vector<16xf32>
    %462 = vector.shape_cast %461 : vector<16xf32> to vector<16x1xf32>
    %463 = math.log %462 : vector<16x1xf32>
    %464 = arith.addf %457, %463 : vector<16x1xf32>
    %c0_213 = arith.constant 0 : index
    %c0_214 = arith.constant 0 : index
    %465 = vector.load %arg4[%c0_213, %c0_214] : memref<16x50xf32, #tpu.memory_space<vmem>>, vector<16x50xf32>
    %466 = arith.mulf %465, %454 : vector<16x50xf32>
    %cst_215 = arith.constant dense<0.000000e+00> : vector<16xf32>
    %467 = vector.multi_reduction <add>, %466, %cst_215 [1] : vector<16x50xf32> to vector<16xf32>
    %468 = vector.shape_cast %467 : vector<16xf32> to vector<16x1xf32>
    %469 = arith.subf %464, %468 : vector<16x1xf32>
    %c0_216 = arith.constant 0 : index
    %c0_217 = arith.constant 0 : index
    %470 = vector.load %arg26[%c0_216, %c0_217] : memref<16x1xf32, #tpu.memory_space<vmem>>, vector<16x1xf32>
    tpu.vector_store %arg26[%c0_216, %c0_217], %469 {strides = array<i32>} : memref<16x1xf32, #tpu.memory_space<vmem>>, vector<16x1xf32>,
    return
  }
}

</mosaic_0001>

<bundles_post_ra>
// kernel: eq.1
= control target key start
LH: loop header
LB: loop body
LE: loop exit
PB: predicated region body
PF: predicated region fallthrough
CT: control target
= control target key end

     0   :  { %vm7_vm0 = vcmask 64512   ;;  %vm13_vm1 = vcmask 130112   ;;  %s39_s0 = inlined_call_operand.vmem [shape: s32[2,8], index: 0, kind: input, shape index: {}]   ;;  %s40_s1 = inlined_call_operand.vmem [shape: s32[16], index: 1, kind: output, shape index: {}]  }
   0x1   :  { %v4_v0 = vld [vmem:[%s39_s0] sm:$0x3]  ;;  %s22_s0 = smov 8  }
   0x2   :  { %5 = vst [vmem:[#allocation1] sm:$0x3] %v4_v0 }
   0x9   :  { %v10_v1 = vld [vmem:[#allocation1 + $0x1] sm:$0x1]   ;;  %v6_v2 = vld [vmem:[#allocation1] sm:$0x1]  }
   0xa   :  { %11 = vrot.lane.b32.xlu0 %v10_v1, %s22_s0  ;;  %8 = vst.msk [vmem:[#allocation0] sm:$0x1] %vm7_vm0, %v6_v2  }
  0x7c   :  { %v12_v3 = vpop.permute.xlu0 %11  }
  0x7d   :  { %14 = vst.msk [vmem:[#allocation0] sm:$0x1] %vm13_vm1, %v12_v3  }
  0x84   :  { %v18_v4 = vld [vmem:[#allocation0] sm:$0x1] }
  0x85   :  { %20 = vst [vmem:[%s40_s1] sm:$0x1] %v18_v4 }

// kernel: bert_forward.1
= control target key start
LH: loop header
LB: loop body
LE: loop exit
PB: predicated region body
PF: predicated region fallthrough
CT: control target
= control target key end

     0   :  { %s4601_s0 = inlined_call_operand.vmem [shape: f32[16,32], index: 0, kind: input, shape index: {}]   ;;  %s4602_s1 = inlined_call_operand.vmem [shape: f32[8,32], index: 1, kind: input, shape index: {}]   ;;  %s4603_s2 = inlined_call_operand.vmem [shape: f32[1,32], index: 2, kind: input, shape index: {}]   ;;  %s4604_s3 = inlined_call_operand.vmem [shape: f32[16,16], index: 3, kind: input, shape index: {}]   ;;  %s4605_s4 = inlined_call_operand.vmem [shape: f32[16,50], index: 4, kind: input, shape index: {}]   ;;  %s4606_s5 = inlined_call_operand.vmem [shape: f32[1,32], index: 5, kind: input, shape index: {}]   ;;  %s4607_s6 = inlined_call_operand.vmem [shape: f32[1,32], index: 6, kind: input, shape index: {}]   ;;  %s4608_s7 = inlined_call_operand.vmem [shape: bf16[2,32,96], index: 7, kind: input, shape index: {}]   ;;  %s4609_s8 = inlined_call_operand.vmem [shape: f32[2,1,96], index: 8, kind: input, shape index: {}]   ;;  %s4610_s9 = inlined_call_operand.vmem [shape: bf16[2,4,8,32], index: 9, kind: input, shape index: {}]   ;;  %s4611_s10 = inlined_call_operand.vmem [shape: f32[2,1,32], index: 10, kind: input, shape index: {}]   ;;  %s4612_s11 = inlined_call_operand.vmem [shape: f32[2,1,32], index: 11, kind: input, shape index: {}]   ;;  %s4613_s12 = inlined_call_operand.vmem [shape: f32[2,1,32], index: 12, kind: input, shape index: {}]   ;;  %s4614_s13 = inlined_call_operand.vmem [shape: bf16[2,32,64], index: 13, kind: input, shape index: {}]   ;;  %s4615_s14 = inlined_call_operand.vmem [shape: f32[2,1,64], index: 14, kind: input, shape index: {}]   ;;  %s4616_s15 = inlined_call_operand.vmem [shape: bf16[2,64,32], index: 15, kind: input, shape index: {}]   ;;  %s4617_s16 = inlined_call_operand.vmem [shape: f32[2,1,32], index: 16, kind: input, shape index: {}]   ;;  %s4618_s17 = inlined_call_operand.vmem [shape: f32[2,1,32], index: 17, kind: input, shape index: {}]   ;;  %s4619_s18 = inlined_call_operand.vmem [shape: f32[2,1,32], index: 18, kind: input, shape index: {}]   ;;  %s4620_s19 = inlined_call_operand.vmem [shape: bf16[32,32], index: 19, kind: input, shape index: {}]   ;;  %s4621_s20 = inlined_call_operand.vmem [shape: f32[1,32], index: 20, kind: input, shape index: {}]   ;;  %s4622_s21 = inlined_call_operand.vmem [shape: f32[1,32], index: 21, kind: input, shape index: {}]   ;;  %s4623_s22 = inlined_call_operand.vmem [shape: f32[1,32], index: 22, kind: input, shape index: {}]   ;;  %s4624_s23 = inlined_call_operand.vmem [shape: bf16[32,50], index: 23, kind: input, shape index: {}]   ;;  %s4625_s24 = inlined_call_operand.vmem [shape: f32[1,50], index: 24, kind: input, shape index: {}]   ;;  %s4626_s25 = inlined_call_operand.hbm [shape: f32[16,50], index: 25, kind: output, shape index: {0}]   ;;  %s4627_s26 = inlined_call_operand.vmem [shape: f32[16,1], index: 26, kind: output, shape index: {1}]  }
   0x1   :  { %4645 = sst [smem:[#allocation5_spill]] %s4601_s0 }
   0x2   :  { %4646 = sst [smem:[#allocation6_spill]] %s4602_s1 }
   0x3   :  { %4647 = sst [smem:[#allocation7_spill]] %s4603_s2 }
   0x4   :  { %4648 = sst [smem:[#allocation8_spill]] %s4604_s3 }
   0x5   :  { %4649 = sst [smem:[#allocation9_spill]] %s4605_s4 }
   0x6   :  { %4650 = sst [smem:[#allocation10_spill]] %s4606_s5 }
   0x7   :  { %4651 = sst [smem:[#allocation11_spill]] %s4607_s6 }
   0x8   :  { %4652 = sst [smem:[#allocation12_spill]] %s4608_s7 }
   0x9   :  { %4653 = sst [smem:[#allocation13_spill]] %s4609_s8 }
   0xa   :  { %4654 = sst [smem:[#allocation14_spill]] %s4610_s9 }
   0xb   :  { %4655 = sst [smem:[#allocation15_spill]] %s4611_s10 }
   0xc   :  { %4656 = sst [smem:[#allocation16_spill]] %s4622_s21 }
   0xd   :  { %s4657_s7 = sld [smem:[#allocation6_spill]]  ;;  %s4658_s21 = sld [smem:[#allocation5_spill]]  ;;  %vm100_vm0 = vcmask 261120  }
   0xe   :  { %s4659_s0 = sld [smem:[#allocation7_spill]] }
  0x13   :  { %v84_v0 = vld [vmem:[%s4657_s7] sm:$0xff]  ;;  %v86_v4 = vld [vmem:[%s4658_s21 + $0x8] sm:$0xff] }
  0x14   :  { %v85_v1 = vld [vmem:[%s4658_s21] sm:$0xff]  ;;  %v88_v5 = vadd.f32 %v86_v4, %v84_v0 }
  0x15   :  { %v3102_v2 = vld [vmem:[%s4659_s0] ss:$0 sm:$0xff]  ;;  %v87_v3 = vadd.f32 %v85_v1, %v84_v0 }
  0x16   :  { %v97_v7 = vadd.f32 %v3102_v2, %v88_v5 }
  0x17   :  { %v96_v6 = vadd.f32 %v3102_v2, %v87_v3 }
  0x18   :  { %v104_v9 = vsel %vm100_vm0, %v97_v7, 0.0 }
  0x19   :  { %v101_v8 = vsel %vm100_vm0, %v96_v6, 0.0 }
  0x1a   :  { %102 = vadd.xlane.f32.xlu0 %v101_v8 }
  0x1e   :  { %105 = vadd.xlane.f32.xlu0 %v104_v9 }
  0x1f   :  { %32 = vsyncpa [#allocation3], 0  ;;  %s4660_s5 = sld [smem:[#allocation12_spill]]  ;;  %v3910_v21 = vmov 0.0   ;;  %vm3911_vm1 = vmmov 0   ;;  %s4661_s3 = sld [smem:[#allocation10_spill]] }
  0x20   :  { %3348 = vmatprep.subr.bf16.mxu0 %v3910_v21  ;;  %3352 = vmatprep.mubr.msk.bf16.mxu0 %vm3911_vm1, %v3910_v21  ;;  %s4662_s8 = sld [smem:[#allocation11_spill]]  ;;  %s4663_s0 = sld [smem:[#allocation13_spill]]  ;;  %vm220_vm2 = vcmask 64512   ;;  %vm304_vm4 = vcmask 130048   ;;  %vm622_vm5 = vcmask 1043456   ;;  %vm1399_vm6 = vcmask 523264  }
  0x21   :  { %s3912_s9 = smov 88   ;;  %s3913_s30 = smov 96   ;;  %vm4123_vm3 = vmpackc.low %vm220_vm2, %vm220_vm2  ;;  %vm3040_vm7 = vcmask 408576  }
  0x22   :  { %s3914_s21 = smov 120   ;;  %s4666_s6 = sld [smem:[#allocation8_spill]] }
  0x23   :  { %s4644_s7 = smov 64   ;;  %s4643_s28 = smov 80  }
  0x24   :  { %s4667_s2 = sld [smem:[#allocation14_spill]]  ;;  %s4636_s27 = smov 48  }
  0x25   :  { %v3756_v20 = vld [vmem:[%s4660_s5] sm:$0xff]   ;;  %v3757_v22 = vld [vmem:[%s4660_s5 + $0x8] sm:$0xff]   ;;  %s4637_s4 = smov 104   ;;  %s4639_s29 = smov 72  }
  0x26   :  { %3349 = vmatpush3.bf16.msra.mxu0 %v3756_v20  ;;  %v3103_v31 = vld [vmem:[%s4661_s3] ss:$0 sm:$0xff]  ;;  %s4640_s3 = smov 56   ;;  %s4635_s10 = smov 40  }
  0x27   :  { %3350 = vmatprep.subr.bf16.mxu0 %v3910_v21  ;;  %v3104_v35 = vld [vmem:[%s4662_s8] ss:$0 sm:$0xff]  ;;  %s4641_s8 = smov 112   ;;  %s3923_s1 = smov [#allocation2]  }
  0x28   :  { %v3105_v40 = vld [vmem:[%s4663_s0] ss:$0 sm:$0xff]  ;;  %v4145_v59 = vld [vmem:[%s4666_s6 + $0x8] sm:$0xff] }
  0x29   :  { %v4150_v60 = vld [vmem:[%s4666_s6] sm:$0xff] }
  0x2a   :  { %3351 = vmatpush3.bf16.msra.mxu0 %v3757_v22 }
  0xa7   :  { %v103_v10 = vpop.xlane.xlu0 %102 }
  0xa8   :  { %v108_v11 = vmul.f32 0.03125, %v103_v10 }
  0xaa   :  { %v110_v12 = vsub.f32 %v96_v6, %v108_v11 }
  0xab   :  { %v106_v13 = vpop.xlane.xlu0 %105 }
  0xac   :  { %v109_v14 = vmul.f32 0.03125, %v106_v13  ;;  %v112_v15 = vmul.f32 %v110_v12, %v110_v12 }
  0xae   :  { %v111_v16 = vsub.f32 %v97_v7, %v109_v14  ;;  %v114_v17 = vsel %vm100_vm0, %v112_v15, 0.0 }
  0xaf   :  { %115 = vadd.xlane.f32.xlu1 %v114_v17 }
  0xb0   :  { %v113_v18 = vmul.f32 %v111_v16, %v111_v16 }
  0xb2   :  { %v117_v19 = vsel %vm100_vm0, %v113_v18, 0.0 }
  0xb3   :  { %118 = vadd.xlane.f32.xlu1 %v117_v19 }
 0x13c   :  { %v116_v23 = vpop.xlane.xlu1 %115 }
 0x13d   :  { %v120_v24 = vmul.f32 0.03125, %v116_v23 }
 0x13f   :  { %v122_v25 = vadd.f32 1e-12, %v120_v24 }
 0x140   :  { %v119_v26 = vpop.xlane.xlu1 %118 }
 0x141   :  { %3776 = vrsqrt.f32 %v122_v25  ;;  %v121_v27 = vmul.f32 0.03125, %v119_v26 }
 0x143   :  { %v123_v28 = vadd.f32 1e-12, %v121_v27 }
 0x145   :  { %3778 = vrsqrt.f32 %v123_v28 }
 0x14b   :  { %v3777_v29 = vpop.eup %3776 }
 0x14c   :  { %v126_v30 = vmul.f32 %v3777_v29, %v110_v12 }
 0x14e   :  { %v134_v34 = vmul.f32 %v3103_v31, %v126_v30  ;;  %v3121_v30 = vld [vmem:[%s4667_s2 + $0x4] sm:$0xf] }
 0x14f   :  { %v3779_v32 = vpop.eup %3778 }
 0x150   :  { %v127_v33 = vmul.f32 %v3779_v32, %v111_v16  ;;  %v4093_v37 = vadd.f32 %v3104_v35, %v134_v34 }
 0x152   :  { %v135_v36 = vmul.f32 %v3103_v31, %v127_v33  ;;  %v624_v31 = vsel %vm622_vm5, %v3121_v30, 0 }
 0x154   :  { %v4095_v38 = vadd.f32 %v3104_v35, %v135_v36 }
 0x156   :  { %v150_v39 = vpack.c.bf16 %v4095_v38, %v4093_v37 }
 0x158   :  { %3353 = vmatmul.mubr.msk.bf16.vlgmr.msra.gmra.mrb[0].mxu0 %vm100_vm0, %v150_v39 }
 0x22b   :  { %v207_v41 = vpop.f32.mrb[0].mxu0 }
 0x22c   :  { %v4103_v42 = vadd.f32 %v3105_v40, %v207_v41  ;;  %v3354_v43 = vpop.f32.mrb[1].mxu0 }
 0x22d   :  { %v210_v44 = vpop.f32.mrb[2].mxu0 }
 0x22e   :  { %v4105_v45 = vadd.f32 %v3105_v40, %v210_v44  ;;  %v3355_v46 = vpop.f32.mrb[3].mxu0  ;;  %3360 = vmatprep.mubr.msk.f32.mxu1 %vm220_vm2, %v4103_v42 }
 0x230   :  { %v4111_v47 = vpack.i.bf16 %v4105_v45, %v4103_v42 }
 0x232   :  { %3682 = vrot.lane.b32.xlu1 %v4111_v47, %s3912_s9  ;;  %3677 = vrot.lane.b32.xlu0 %v4111_v47, %s3913_s30 }
 0x236   :  { %416 = vrot.lane.b32.xlu1 %v4103_v42, %s3914_s21 }
 0x23a   :  { %418 = vrot.lane.b32.xlu1 %v4105_v45, %s3914_s21 }
 0x2a4   :  { %v3683_v48 = vpop.permute.xlu1 %3682  ;;  %v3678_v49 = vpop.permute.xlu0 %3677 }
 0x2a5   :  { %v3685_v50 = vunpack.i.h.bf16 %v3683_v48  ;;  %v3684_v51 = vunpack.i.l.bf16 %v3683_v48  ;;  %v3680_v52 = vunpack.i.h.bf16 %v3678_v49  ;;  %v3679_v53 = vunpack.i.l.bf16 %v3678_v49 }
 0x2a7   :  { %v3590_v55 = vpack.c.bf16 %v3685_v50, %v3684_v51  ;;  %v3580_v56 = vpack.c.bf16 %v3680_v52, %v3679_v53 }
 0x2a8   :  { %v417_v57 = vpop.permute.xlu1 %416 }
 0x2a9   :  { %3582 = vmatprep.subr.msk.bf16.mxu1 %vm4123_vm3, %v3580_v56  ;;  %3592 = vmatprep.subr.msk.bf16.mxu0 %vm4123_vm3, %v3590_v55 }
 0x2aa   :  { %3374 = vmatprep.mubr.msk.f32.mxu0 %vm220_vm2, %v417_v57  ;;  %3585 = vmatpush3.bf16.xpose.msk.msra.mxu1 %vm4123_vm3, %v3580_v56 }
 0x2ab   :  { %3595 = vmatpush3.bf16.xpose.msk.msra.mxu0 %vm4123_vm3, %v3590_v55 }
 0x2ac   :  { %3384 = vmatprep.subr.bf16.mxu0 %v3910_v21  ;;  %v419_v58 = vpop.permute.xlu1 %418 }
 0x2b1   :  { %3361 = vmatmul.mubr.msk.f32.vlgmr.msra.gmra.mrb[0].mxu1 %vm220_vm2, %v4105_v45 }
 0x2b2   :  { %3375 = vmatmul.mubr.msk.f32.vlgmr.msra.gmra.mrb[4].mxu0 %vm220_vm2, %v419_v58 }
 0x2b3   :  { %3386 = vmatprep.mubr.msk.bf16.mxu0 %vm3911_vm1, %v3910_v21  ;;  %3385 = vmatpush3.bf16.msra.mxu0 %v624_v31 }
 0x384   :  { %v3362_v61 = vpop.f32.mrb[0].mxu1 }
 0x385   :  { %v301_v62 = vadd.f32 %v3362_v61, %v4145_v59  ;;  %v3376_v63 = vpop.f32.mrb[4].mxu0  ;;  %v295_v0 = vpop.f32.mrb[1].mxu1 }
 0x386   :  { %v296_v1 = vadd.f32 %v295_v0, %v4150_v60  ;;  %v498_v2 = vpop.f32.mrb[5].mxu0  ;;  %v504_v6 = vadd.f32 %v3376_v63, %v4145_v59  ;;  %v414_v0 = vld [vmem:[%s4667_s2] sm:$0xf] }
 0x387   :  { %v308_v3 = vsel %vm304_vm4, %v301_v62, -inf  ;;  %v499_v4 = vadd.f32 %v498_v2, %v4150_v60 }
 0x388   :  { %309 = vmax.xlane.f32.xlu1 %v308_v3  ;;  %v305_v5 = vsel %vm304_vm4, %v296_v1, -inf  ;;  %v510_v8 = vsel %vm304_vm4, %v504_v6, -inf }
 0x389   :  { %306 = vmax.xlane.f32.xlu0 %v305_v5  ;;  %v507_v7 = vsel %vm304_vm4, %v499_v4, -inf }
 0x38d   :  { %508 = vmax.xlane.f32.xlu0 %v507_v7 }
 0x391   :  { %511 = vmax.xlane.f32.xlu0 %v510_v8 }
 0x415   :  { %v310_v9 = vpop.xlane.xlu1 %309 }
 0x416   :  { %v312_v10 = vsub.f32 %v301_v62, %v310_v9  ;;  %v307_v11 = vpop.xlane.xlu0 %306 }
 0x417   :  { %v311_v12 = vsub.f32 %v296_v1, %v307_v11  ;;  %v671_v1 = vsel %vm622_vm5, %v414_v0, 0 }
 0x418   :  { %v315_v13 = vmul.f32 1.442695, %v312_v10 }
 0x419   :  { %v313_v14 = vmul.f32 1.442695, %v311_v12 }
 0x41a   :  { %3780 = vpow2.f32 %v315_v13  ;;  %v509_v15 = vpop.xlane.xlu0 %508 }
 0x41b   :  { %3782 = vpow2.f32 %v313_v14  ;;  %v513_v16 = vsub.f32 %v499_v4, %v509_v15 }
 0x41d   :  { %v515_v17 = vmul.f32 1.442695, %v513_v16 }
 0x41e   :  { %v512_v18 = vpop.xlane.xlu0 %511 }
 0x41f   :  { %3784 = vpow2.f32 %v515_v17  ;;  %v514_v19 = vsub.f32 %v504_v6, %v512_v18 }
 0x421   :  { %v517_v20 = vmul.f32 1.442695, %v514_v19 }
 0x423   :  { %3786 = vpow2.f32 %v517_v20 }
 0x424   :  { %v3781_v22 = vpop.eup %3780 }
 0x425   :  { %v3783_v23 = vpop.eup %3782  ;;  %v320_v24 = vsel %vm304_vm4, %v3781_v22, 0.0 }
 0x426   :  { %321 = vadd.xlane.f32.xlu1 %v320_v24  ;;  %v317_v25 = vsel %vm304_vm4, %v3783_v23, 0.0 }
 0x427   :  { %318 = vadd.xlane.f32.xlu0 %v317_v25 }
 0x429   :  { %v3785_v26 = vpop.eup %3784 }
 0x42a   :  { %v519_v27 = vsel %vm304_vm4, %v3785_v26, 0.0 }
 0x42b   :  { %520 = vadd.xlane.f32.xlu0 %v519_v27 }
 0x42d   :  { %v3787_v28 = vpop.eup %3786 }
 0x42e   :  { %v522_v29 = vsel %vm304_vm4, %v3787_v28, 0.0 }
 0x42f   :  { %523 = vadd.xlane.f32.xlu1 %v522_v29 }
 0x440   :  { %3692 = vrot.lane.b32.xlu1 %v4111_v47, %s4640_s3 }
 0x441   :  { %3687 = vrot.lane.b32.xlu0 %v4111_v47, %s4644_s7 }
 0x444   :  { %3697 = vrot.lane.b32.xlu1 %v4111_v47, %s4643_s28 }
 0x445   :  { %716 = vrot.lane.b32.xlu0 %v4105_v45, %s4641_s8 }
 0x448   :  { %714 = vrot.lane.b32.xlu1 %v4103_v42, %s4641_s8 }
 0x4b3   :  { %v322_v32 = vpop.xlane.xlu1 %321 }
 0x4b4   :  { %v319_v33 = vpop.xlane.xlu0 %318 }
 0x4b5   :  { %3788 = vrcp.f32 %v319_v33 }
 0x4b6   :  { %3790 = vrcp.f32 %v322_v32 }
 0x4b8   :  { %v521_v34 = vpop.xlane.xlu0 %520 }
 0x4b9   :  { %3792 = vrcp.f32 %v521_v34 }
 0x4bc   :  { %v524_v35 = vpop.xlane.xlu1 %523  ;;  %v3688_v36 = vpop.permute.xlu0 %3687 }
 0x4bd   :  { %3794 = vrcp.f32 %v524_v35  ;;  %v3690_v39 = vunpack.i.h.bf16 %v3688_v36  ;;  %v3689_v40 = vunpack.i.l.bf16 %v3688_v36 }
 0x4bf   :  { %v3789_v41 = vpop.eup %3788  ;;  %v3586_v43 = vpack.c.bf16 %v3690_v39, %v3689_v40 }
 0x4c0   :  { %v3791_v44 = vpop.eup %3790  ;;  %v3693_v46 = vpop.permute.xlu1 %3692  ;;  %v325_v48 = vmul.f32 %v3789_v41, %v3783_v23 }
 0x4c1   :  { %v3695_v49 = vunpack.i.h.bf16 %v3693_v46  ;;  %v3694_v50 = vunpack.i.l.bf16 %v3693_v46  ;;  %3587 = vmatprep.subr.bf16.mxu1 %v3586_v43  ;;  %v326_v52 = vmul.f32 %v3791_v44, %v3781_v22  ;;  %v717_v9 = vpop.permute.xlu0 %716 }
 0x4c2   :  { %3589 = vmatpush3.bf16.msra.mxu1 %v3586_v43  ;;  %3367 = vmatprep.mubr.msk.f32.mxu1 %vm304_vm4, %v325_v48 }
 0x4c3   :  { %v3793_v51 = vpop.eup %3792  ;;  %v3596_v53 = vpack.c.bf16 %v3695_v49, %v3694_v50 }
 0x4c4   :  { %v3698_v55 = vpop.permute.xlu1 %3697  ;;  %v527_v56 = vmul.f32 %v3793_v51, %v3785_v26 }
 0x4c5   :  { %v3700_v57 = vunpack.i.h.bf16 %v3698_v55  ;;  %v3699_v58 = vunpack.i.l.bf16 %v3698_v55  ;;  %3368 = vmatmul.mubr.msk.f32.vlgmr.msra.gmra.mrb[2].mxu1 %vm304_vm4, %v326_v52  ;;  %3597 = vmatprep.subr.bf16.mxu1 %v3596_v53 }
 0x4c6   :  { %3599 = vmatpush3.bf16.msra.mxu1 %v3596_v53  ;;  %3381 = vmatprep.mubr.msk.f32.mxu1 %vm304_vm4, %v527_v56 }
 0x4c7   :  { %v3795_v61 = vpop.eup %3794  ;;  %v3600_v62 = vpack.c.bf16 %v3700_v57, %v3699_v58  ;;  %3390 = vmatprep.subr.bf16.mxu1 %v3910_v21  ;;  %v3130_v57 = vld [vmem:[%s4667_s2 + $0x8] sm:$0xf] }
 0x4c8   :  { %v528_v63 = vmul.f32 %v3795_v61, %v3787_v28  ;;  %v715_v8 = vpop.permute.xlu1 %714  ;;  %v921_v58 = vsel %vm622_vm5, %v3130_v57, 0 }
 0x4c9   :  { %3602 = vmatprep.subr.msk.bf16.mxu0 %vm4123_vm3, %v3600_v62 }
 0x4ca   :  { %3382 = vmatmul.mubr.msk.f32.vlgmr.msra.gmra.mrb[4].mxu1 %vm304_vm4, %v528_v63 }
 0x4cb   :  { %3392 = vmatprep.mubr.msk.bf16.mxu1 %vm3911_vm1, %v3910_v21  ;;  %3391 = vmatpush3.bf16.msra.mxu1 %v671_v1 }
 0x598   :  { %v3369_v2 = vpop.f32.mrb[2].mxu1 }
 0x599   :  { %v405_v3 = vpop.f32.mrb[3].mxu1 }
 0x59a   :  { %v415_v4 = vpack.c.bf16 %v3369_v2, %v405_v3 }
 0x59c   :  { %3393 = vmatmul.mubr.msk.bf16.vlgmr.msra.gmra.mrb[8].mxu1 %vm220_vm2, %v415_v4 }
 0x59d   :  { %v3383_v5 = vpop.f32.mrb[4].mxu1 }
 0x59e   :  { %v607_v6 = vpop.f32.mrb[5].mxu1 }
 0x59f   :  { %v618_v7 = vpack.c.bf16 %v3383_v5, %v607_v6 }
 0x5a1   :  { %3387 = vmatmul.mubr.msk.bf16.vlgmr.msra.gmra.mrb[8].mxu0 %vm220_vm2, %v618_v7 }
 0x5a2   :  { %3605 = vmatpush3.bf16.xpose.msk.msra.mxu0 %vm4123_vm3, %v3600_v62  ;;  %3400 = vmatprep.mubr.msk.f32.mxu0 %vm220_vm2, %v715_v8 }
 0x5a3   :  { %3410 = vmatprep.subr.bf16.mxu0 %v3910_v21 }
 0x5a9   :  { %3401 = vmatmul.mubr.msk.f32.vlgmr.msra.gmra.mrb[6].mxu0 %vm220_vm2, %v717_v9 }
 0x5aa   :  { %3412 = vmatprep.mubr.msk.bf16.mxu0 %vm3911_vm1, %v3910_v21  ;;  %3411 = vmatpush3.bf16.msra.mxu0 %v921_v58 }
 0x66f   :  { %v707_v10 = vpop.f32.mrb[8].mxu1 }
 0x670   :  { %v3394_v11 = vpop.f32.mrb[9].mxu1 }
 0x671   :  { %v710_v12 = vpop.f32.mrb[10].mxu1 }
 0x672   :  { %v3395_v13 = vpop.f32.mrb[11].mxu1 }
 0x674   :  { %v660_v14 = vpop.f32.mrb[8].mxu0 }
 0x675   :  { %v4200_v15 = vadd.f32 %v707_v10, %v660_v14  ;;  %v3388_v16 = vpop.f32.mrb[9].mxu0 }
 0x676   :  { %v663_v17 = vpop.f32.mrb[10].mxu0 }
 0x677   :  { %v4202_v18 = vadd.f32 %v710_v12, %v663_v17  ;;  %v3389_v19 = vpop.f32.mrb[11].mxu0 }
 0x67c   :  { %v3402_v20 = vpop.f32.mrb[6].mxu0 }
 0x67d   :  { %v802_v22 = vadd.f32 %v3402_v20, %v4145_v59  ;;  %v796_v23 = vpop.f32.mrb[7].mxu0 }
 0x67e   :  { %v797_v24 = vadd.f32 %v796_v23, %v4150_v60 }
 0x67f   :  { %v808_v25 = vsel %vm304_vm4, %v802_v22, -inf }
 0x680   :  { %809 = vmax.xlane.f32.xlu0 %v808_v25  ;;  %v805_v26 = vsel %vm304_vm4, %v797_v24, -inf }
 0x681   :  { %806 = vmax.xlane.f32.xlu1 %v805_v26 }
 0x692   :  { %3702 = vrot.lane.b32.xlu1 %v4111_v47, %s4636_s27  ;;  %s4674_s27 = smov 104  }
 0x696   :  { %966 = vrot.lane.b32.xlu1 %v4103_v42, %s4637_s4 }
 0x69a   :  { %968 = vrot.lane.b32.xlu1 %v4105_v45, %s4637_s4 }
 0x70d   :  { %v810_v27 = vpop.xlane.xlu0 %809 }
 0x70e   :  { %v812_v28 = vsub.f32 %v802_v22, %v810_v27  ;;  %v807_v29 = vpop.xlane.xlu1 %806 }
 0x70f   :  { %v811_v30 = vsub.f32 %v797_v24, %v807_v29 }
 0x710   :  { %v815_v31 = vmul.f32 1.442695, %v812_v28 }
 0x711   :  { %v813_v32 = vmul.f32 1.442695, %v811_v30 }
 0x712   :  { %3796 = vpow2.f32 %v815_v31  ;;  %v3703_v33 = vpop.permute.xlu1 %3702 }
 0x713   :  { %v3705_v34 = vunpack.i.h.bf16 %v3703_v33  ;;  %v3704_v35 = vunpack.i.l.bf16 %v3703_v33  ;;  %3798 = vpow2.f32 %v813_v32 }
 0x715   :  { %v3606_v36 = vpack.c.bf16 %v3705_v34, %v3704_v35 }
 0x716   :  { %v967_v55 = vpop.permute.xlu1 %966 }
 0x717   :  { %3607 = vmatprep.subr.bf16.mxu1 %v3606_v36 }
 0x718   :  { %3609 = vmatpush3.bf16.msra.mxu1 %v3606_v36 }
 0x71a   :  { %v969_v56 = vpop.permute.xlu1 %968 }
 0x71c   :  { %v3797_v39 = vpop.eup %3796 }
 0x71d   :  { %v820_v42 = vsel %vm304_vm4, %v3797_v39, 0.0  ;;  %v3799_v40 = vpop.eup %3798 }
 0x71e   :  { %821 = vadd.xlane.f32.xlu0 %v820_v42  ;;  %v817_v45 = vsel %vm304_vm4, %v3799_v40, 0.0 }
 0x722   :  { %818 = vadd.xlane.f32.xlu0 %v817_v45 }
 0x738   :  { %3707 = vrot.lane.b32.xlu0 %v4111_v47, %s4639_s29  ;;  %s4668_s29 = sld [smem:[#allocation15_spill]] }
 0x73e   :  { %v3140_v42 = vld [vmem:[%s4668_s29] ss:$0 sm:$0xff] }
 0x7ab   :  { %v822_v41 = vpop.xlane.xlu0 %821 }
 0x7ac   :  { %3800 = vrcp.f32 %v822_v41 }
 0x7af   :  { %v819_v43 = vpop.xlane.xlu0 %818 }
 0x7b0   :  { %3802 = vrcp.f32 %v819_v43 }
 0x7b3   :  { %v3708_v44 = vpop.permute.xlu0 %3707 }
 0x7b4   :  { %v3710_v46 = vunpack.i.h.bf16 %v3708_v44  ;;  %v3709_v48 = vunpack.i.l.bf16 %v3708_v44 }
 0x7b6   :  { %v3610_v49 = vpack.c.bf16 %v3710_v46, %v3709_v48  ;;  %v3801_v50 = vpop.eup %3800 }
 0x7b7   :  { %v826_v53 = vmul.f32 %v3801_v50, %v3797_v39 }
 0x7b8   :  { %3612 = vmatprep.subr.msk.bf16.mxu1 %vm4123_vm3, %v3610_v49 }
 0x7ba   :  { %v3803_v51 = vpop.eup %3802 }
 0x7bb   :  { %v825_v52 = vmul.f32 %v3803_v51, %v3799_v40 }
 0x7bd   :  { %3407 = vmatprep.mubr.msk.f32.mxu1 %vm304_vm4, %v825_v52 }
 0x7be   :  { %3408 = vmatmul.mubr.msk.f32.vlgmr.msra.gmra.mrb[6].mxu1 %vm304_vm4, %v826_v53 }
 0x7bf   :  { %3615 = vmatpush3.bf16.xpose.msk.msra.mxu1 %vm4123_vm3, %v3610_v49  ;;  %3420 = vmatprep.mubr.msk.f32.mxu1 %vm220_vm2, %v967_v55 }
 0x7c0   :  { %3430 = vmatprep.subr.bf16.mxu1 %v3910_v21 }
 0x7c6   :  { %3421 = vmatmul.mubr.msk.f32.vlgmr.msra.gmra.mrb[12].mxu1 %vm220_vm2, %v969_v56 }
 0x7c7   :  { %3432 = vmatprep.mubr.msk.bf16.mxu1 %vm3911_vm1, %v3910_v21 }
 0x891   :  { %v3409_v61 = vpop.f32.mrb[6].mxu1 }
 0x892   :  { %v905_v62 = vpop.f32.mrb[7].mxu1 }
 0x893   :  { %v916_v63 = vpack.c.bf16 %v3409_v61, %v905_v62 }
 0x895   :  { %3413 = vmatmul.mubr.msk.bf16.vlgmr.msra.gmra.mrb[12].mxu0 %vm220_vm2, %v916_v63 }
 0x899   :  { %v3422_v0 = vpop.f32.mrb[12].mxu1 }
 0x89a   :  { %v1054_v1 = vadd.f32 %v3422_v0, %v4145_v59  ;;  %v1048_v2 = vpop.f32.mrb[13].mxu1 }
 0x89b   :  { %v1049_v3 = vadd.f32 %v1048_v2, %v4150_v60 }
 0x89c   :  { %v1060_v4 = vsel %vm304_vm4, %v1054_v1, -inf }
 0x89d   :  { %1061 = vmax.xlane.f32.xlu0 %v1060_v4  ;;  %v1057_v5 = vsel %vm304_vm4, %v1049_v3, -inf }
 0x89e   :  { %1058 = vmax.xlane.f32.xlu1 %v1057_v5 }
 0x8af   :  { %3712 = vrot.lane.b32.xlu1 %v4111_v47, %s4635_s10 }
 0x92a   :  { %v1062_v6 = vpop.xlane.xlu0 %1061 }
 0x92b   :  { %v1064_v7 = vsub.f32 %v1054_v1, %v1062_v6  ;;  %v1059_v8 = vpop.xlane.xlu1 %1058  ;;  %v3759_v1 = vld [vmem:[%s4614_s13 + $0x8] sm:$0xff]  }
 0x92c   :  { %v1063_v9 = vsub.f32 %v1049_v3, %v1059_v8 }
 0x92d   :  { %v1067_v10 = vmul.f32 1.442695, %v1064_v7 }
 0x92e   :  { %v1065_v11 = vmul.f32 1.442695, %v1063_v9 }
 0x92f   :  { %v3713_v12 = vpop.permute.xlu1 %3712 }
 0x930   :  { %3804 = vpow2.f32 %v1065_v11  ;;  %v3715_v13 = vunpack.i.h.bf16 %v3713_v12  ;;  %v3714_v14 = vunpack.i.l.bf16 %v3713_v12 }
 0x931   :  { %3806 = vpow2.f32 %v1067_v10  ;;  %v3141_v10 = vld [vmem:[%s4612_s11] ss:$0 sm:$0xff] }
 0x932   :  { %v3616_v16 = vpack.c.bf16 %v3715_v13, %v3714_v14  ;;  %v3142_v14 = vld [vmem:[%s4613_s12] ss:$0 sm:$0xff] }
 0x934   :  { %3617 = vmatprep.subr.bf16.mxu0 %v3616_v16 }
 0x935   :  { %3619 = vmatpush3.bf16.msra.mxu0 %v3616_v16 }
 0x936   :  { %3436 = vmatprep.subr.bf16.mxu0 %v3910_v21 }
 0x93a   :  { %v3805_v17 = vpop.eup %3804 }
 0x93b   :  { %v1069_v19 = vsel %vm304_vm4, %v3805_v17, 0.0  ;;  %v3807_v47 = vpop.eup %3806 }
 0x93c   :  { %1070 = vadd.xlane.f32.xlu0 %v1069_v19  ;;  %v1072_v20 = vsel %vm304_vm4, %v3807_v47, 0.0 }
 0x940   :  { %1073 = vadd.xlane.f32.xlu0 %v1072_v20  ;;  %v3760_v20 = vld [vmem:[%s4616_s15] sm:$0xff]  }
 0x968   :  { %v957_v22 = vpop.f32.mrb[12].mxu0 }
 0x969   :  { %v964_v23 = vadd.f32 %v957_v22, %v4200_v15  ;;  %v3414_v24 = vpop.f32.mrb[13].mxu0  ;;  %v3138_v15 = vld [vmem:[%s4667_s2 + $0xc] sm:$0xf] }
 0x96a   :  { %v960_v25 = vpop.f32.mrb[14].mxu0  ;;  %v3761_v22 = vld [vmem:[%s4616_s15 + $0x8] sm:$0xff]   ;;  %v3763_v24 = vld [vmem:[%s4616_s15 + $0x18] sm:$0xff]  }
 0x96b   :  { %v965_v26 = vadd.f32 %v960_v25, %v4202_v18  ;;  %v3415_v27 = vpop.f32.mrb[15].mxu0  ;;  %v1173_v18 = vsel %vm622_vm5, %v3138_v15, 0  ;;  %v3143_v25 = vld [vmem:[%s4615_s14] ss:$0 sm:$0xff] }
 0x96c   :  { %3431 = vmatpush3.bf16.msra.mxu1 %v1173_v18 }
 0x96d   :  { %3444 = vmatprep.subr.bf16.mxu1 %v3910_v21 }
 0x9c9   :  { %v1071_v28 = vpop.xlane.xlu0 %1070 }
 0x9ca   :  { %3808 = vrcp.f32 %v1071_v28 }
 0x9cd   :  { %v1074_v29 = vpop.xlane.xlu0 %1073 }
 0x9ce   :  { %3810 = vrcp.f32 %v1074_v29 }
 0x9d4   :  { %v3809_v30 = vpop.eup %3808 }
 0x9d5   :  { %v1077_v31 = vmul.f32 %v3809_v30, %v3805_v17 }
 0x9d7   :  { %3427 = vmatprep.mubr.msk.f32.mxu0 %vm304_vm4, %v1077_v31 }
 0x9d8   :  { %v3811_v32 = vpop.eup %3810 }
 0x9d9   :  { %v1078_v33 = vmul.f32 %v3811_v32, %v3807_v47 }
 0x9db   :  { %3428 = vmatmul.mubr.msk.f32.vlgmr.msra.gmra.mrb[16].mxu0 %vm304_vm4, %v1078_v33 }
 0x9dc   :  { %3440 = vmatprep.mubr.msk.bf16.mxu0 %vm3911_vm1, %v3910_v21 }
 0xaae   :  { %v3429_v34 = vpop.f32.mrb[16].mxu0 }
 0xaaf   :  { %v1157_v35 = vpop.f32.mrb[17].mxu0 }
 0xab0   :  { %v1168_v36 = vpack.c.bf16 %v3429_v34, %v1157_v35 }
 0xab2   :  { %3433 = vmatmul.mubr.msk.bf16.vlgmr.msra.gmra.mrb[16].mxu1 %vm220_vm2, %v1168_v36 }
 0xab3   :  { %3452 = vmatprep.mubr.msk.bf16.mxu1 %vm3911_vm1, %v3910_v21  ;;  %3445 = vmatpush3.bf16.msra.mxu1 %v3760_v20 }
 0xab4   :  { %3446 = vmatprep.subr.bf16.mxu1 %v3910_v21 }
 0xab7   :  { %3447 = vmatpush3.bf16.msra.mxu1 %v3761_v22  ;;  %v3153_v22 = vld [vmem:[%s4618_s17] ss:$0 sm:$0xff] }
 0xab8   :  { %3448 = vmatprep.subr.bf16.mxu1 %v3910_v21 }
 0xb85   :  { %v1209_v39 = vpop.f32.mrb[16].mxu1 }
 0xb86   :  { %v1216_v40 = vadd.f32 %v1209_v39, %v964_v23  ;;  %v3434_v45 = vpop.f32.mrb[17].mxu1  ;;  %v3762_v23 = vld [vmem:[%s4616_s15 + $0x10] sm:$0xff]  }
 0xb87   :  { %v1212_v41 = vpop.f32.mrb[18].mxu1  ;;  %3449 = vmatpush3.bf16.msra.mxu1 %v3762_v23 }
 0xb88   :  { %v1225_v43 = vadd.f32 %v3140_v42, %v1216_v40  ;;  %v1217_v44 = vadd.f32 %v1212_v41, %v965_v26  ;;  %v3435_v46 = vpop.f32.mrb[19].mxu1  ;;  %3450 = vmatprep.subr.bf16.mxu1 %v3910_v21 }
 0xb8a   :  { %v1226_v48 = vadd.f32 %v3140_v42, %v1217_v44  ;;  %v1227_v49 = vadd.f32 %v1225_v43, %v4093_v37 }
 0xb8b   :  { %3451 = vmatpush3.bf16.msra.mxu1 %v3763_v24 }
 0xb8c   :  { %v1231_v50 = vsel %vm100_vm0, %v1227_v49, 0.0  ;;  %v1228_v51 = vadd.f32 %v1226_v48, %v4095_v38  ;;  %v3758_v38 = vld [vmem:[%s4614_s13] sm:$0xff]  }
 0xb8d   :  { %1232 = vadd.xlane.f32.xlu0 %v1231_v50  ;;  %3437 = vmatpush3.bf16.msra.mxu0 %v3758_v38 }
 0xb8e   :  { %v1234_v52 = vsel %vm100_vm0, %v1228_v51, 0.0  ;;  %3438 = vmatprep.subr.bf16.mxu0 %v3910_v21 }
 0xb91   :  { %1235 = vadd.xlane.f32.xlu0 %v1234_v52  ;;  %3439 = vmatpush3.bf16.msra.mxu0 %v3759_v1  ;;  %v3147_v52 = vld [vmem:[%s4617_s16] ss:$0 sm:$0xff] }
 0xb92   :  { %3456 = vmatprep.subr.bf16.mxu0 %v3910_v21 }
 0xc1a   :  { %v1233_v53 = vpop.xlane.xlu0 %1232 }
 0xc1b   :  { %v1237_v55 = vmul.f32 0.03125, %v1233_v53 }
 0xc1d   :  { %v1239_v56 = vsub.f32 %v1227_v49, %v1237_v55 }
 0xc1e   :  { %v1236_v57 = vpop.xlane.xlu0 %1235 }
 0xc1f   :  { %v1238_v58 = vmul.f32 0.03125, %v1236_v57  ;;  %v1241_v61 = vmul.f32 %v1239_v56, %v1239_v56 }
 0xc21   :  { %v1240_v62 = vsub.f32 %v1228_v51, %v1238_v58  ;;  %v1243_v63 = vsel %vm100_vm0, %v1241_v61, 0.0 }
 0xc22   :  { %1244 = vadd.xlane.f32.xlu0 %v1243_v63 }
 0xc23   :  { %v1242_v0 = vmul.f32 %v1240_v62, %v1240_v62 }
 0xc25   :  { %v1246_v37 = vsel %vm100_vm0, %v1242_v0, 0.0 }
 0xc26   :  { %1247 = vadd.xlane.f32.xlu0 %v1246_v37 }
 0xcaf   :  { %v1245_v2 = vpop.xlane.xlu0 %1244 }
 0xcb0   :  { %v1249_v3 = vmul.f32 0.03125, %v1245_v2 }
 0xcb2   :  { %v1251_v4 = vadd.f32 1e-12, %v1249_v3 }
 0xcb3   :  { %v1248_v5 = vpop.xlane.xlu0 %1247 }
 0xcb4   :  { %3812 = vrsqrt.f32 %v1251_v4  ;;  %v1250_v6 = vmul.f32 0.03125, %v1248_v5 }
 0xcb6   :  { %v1252_v7 = vadd.f32 1e-12, %v1250_v6 }
 0xcb8   :  { %3814 = vrsqrt.f32 %v1252_v7 }
 0xcbe   :  { %v3813_v8 = vpop.eup %3812 }
 0xcbf   :  { %v1255_v9 = vmul.f32 %v3813_v8, %v1239_v56 }
 0xcc1   :  { %v1263_v12 = vmul.f32 %v3141_v10, %v1255_v9 }
 0xcc2   :  { %v3815_v11 = vpop.eup %3814 }
 0xcc3   :  { %v1256_v13 = vmul.f32 %v3815_v11, %v1240_v62  ;;  %v1271_v17 = vadd.f32 %v3142_v14, %v1263_v12  ;;  %v3765_v11 = vld [vmem:[%s4660_s5 + $0x18] sm:$0xff]  }
 0xcc5   :  { %v1264_v16 = vmul.f32 %v3141_v10, %v1256_v13  ;;  %v3764_v10 = vld [vmem:[%s4660_s5 + $0x10] sm:$0xff]  }
 0xcc7   :  { %v1272_v19 = vadd.f32 %v3142_v14, %v1264_v16 }
 0xcc9   :  { %v1277_v47 = vpack.c.bf16 %v1272_v19, %v1271_v17 }
 0xccb   :  { %3441 = vmatmul.mubr.msk.bf16.vlgmr.msra.gmra.mrb[20].mxu0 %vm100_vm0, %v1277_v47 }
 0xccc   :  { %3460 = vmatprep.mubr.msk.bf16.mxu0 %vm3911_vm1, %v3910_v21  ;;  %3457 = vmatpush3.bf16.msra.mxu0 %v3764_v10 }
 0xccd   :  { %3458 = vmatprep.subr.bf16.mxu0 %v3910_v21 }
 0xcd0   :  { %3459 = vmatpush3.bf16.msra.mxu0 %v3765_v11 }
 0xd9e   :  { %v1334_v26 = vpop.f32.mrb[20].mxu0 }
 0xd9f   :  { %v1335_v27 = vadd.f32 %v3143_v25, %v1334_v26  ;;  %v3442_v28 = vpop.f32.mrb[21].mxu0  ;;  %v3154_v26 = vld [vmem:[%s4619_s18] ss:$0 sm:$0xff] }
 0xda0   :  { %v1337_v29 = vpop.f32.mrb[22].mxu0 }
 0xda1   :  { %v1341_v30 = vmul.f32 %v1335_v27, %v1335_v27  ;;  %v1338_v31 = vadd.f32 %v3143_v25, %v1337_v29  ;;  %v3443_v32 = vpop.f32.mrb[23].mxu0 }
 0xda3   :  { %v1343_v33 = vmul.f32 %v1341_v30, %v1335_v27  ;;  %v1342_v15 = vmul.f32 %v1338_v31, %v1338_v31 }
 0xda5   :  { %v1345_v18 = vmul.f32 0.044715, %v1343_v33  ;;  %v1344_v34 = vmul.f32 %v1342_v15, %v1338_v31 }
 0xda7   :  { %v1347_v35 = vadd.f32 %v1345_v18, %v1335_v27  ;;  %v1346_v36 = vmul.f32 0.044715, %v1344_v34 }
 0xda9   :  { %v1349_v39 = vmul.f32 0.7978846, %v1347_v35  ;;  %v1348_v42 = vadd.f32 %v1346_v36, %v1338_v31 }
 0xdab   :  { %3816 = vtanh.f32 %v1349_v39  ;;  %v1350_v40 = vmul.f32 0.7978846, %v1348_v42 }
 0xdad   :  { %3818 = vtanh.f32 %v1350_v40 }
 0xdb5   :  { %v3817_v45 = vpop.eup %3816 }
 0xdb6   :  { %v1353_v41 = vadd.f32 1.0, %v3817_v45 }
 0xdb7   :  { %v3819_v43 = vpop.eup %3818 }
 0xdb8   :  { %v1355_v44 = vmul.f32 0.5, %v1353_v41  ;;  %v1354_v46 = vadd.f32 1.0, %v3819_v43 }
 0xdba   :  { %v1356_v48 = vmul.f32 0.5, %v1354_v46  ;;  %v1357_v49 = vmul.f32 %v1355_v44, %v1335_v27 }
 0xdbc   :  { %v1358_v50 = vmul.f32 %v1356_v48, %v1338_v31  ;;  %v3160_v31 = vld [vmem:[%s4663_s0 + $0x1] ss:$0 sm:$0xff]  ;;  %s4669_s0 = smov 64  }
 0xdbe   :  { %v1367_v51 = vpack.c.bf16 %v1358_v50, %v1357_v49 }
 0xdc0   :  { %3453 = vmatmul.mubr.msk.bf16.vlgmr.msra.gmra.mrb[20].mxu1 %vm1399_vm6, %v1367_v51 }
 0xe93   :  { %v1437_v53 = vpop.f32.mrb[20].mxu1 }
 0xe94   :  { %v1438_v55 = vadd.f32 %v3147_v52, %v1437_v53  ;;  %v3454_v56 = vpop.f32.mrb[21].mxu1 }
 0xe95   :  { %v1440_v57 = vpop.f32.mrb[22].mxu1 }
 0xe96   :  { %v1441_v58 = vadd.f32 %v3147_v52, %v1440_v57  ;;  %v3455_v61 = vpop.f32.mrb[23].mxu1  ;;  %v1444_v62 = vadd.f32 %v1438_v55, %v1271_v17 }
 0xe98   :  { %v1448_v63 = vsel %vm100_vm0, %v1444_v62, 0.0  ;;  %v1445_v0 = vadd.f32 %v1441_v58, %v1272_v19 }
 0xe99   :  { %1449 = vadd.xlane.f32.xlu1 %v1448_v63 }
 0xe9a   :  { %v1451_v37 = vsel %vm100_vm0, %v1445_v0, 0.0 }
 0xe9b   :  { %1452 = vadd.xlane.f32.xlu0 %v1451_v37 }
 0xf26   :  { %v1450_v38 = vpop.xlane.xlu1 %1449 }
 0xf27   :  { %v1454_v1 = vmul.f32 0.03125, %v1450_v38 }
 0xf28   :  { %v1453_v2 = vpop.xlane.xlu0 %1452 }
 0xf29   :  { %v1456_v3 = vsub.f32 %v1444_v62, %v1454_v1  ;;  %v1455_v4 = vmul.f32 0.03125, %v1453_v2 }
 0xf2b   :  { %v1457_v5 = vsub.f32 %v1445_v0, %v1455_v4  ;;  %v1458_v6 = vmul.f32 %v1456_v3, %v1456_v3 }
 0xf2d   :  { %v1460_v7 = vsel %vm100_vm0, %v1458_v6, 0.0  ;;  %v1459_v8 = vmul.f32 %v1457_v5, %v1457_v5 }
 0xf2e   :  { %1461 = vadd.xlane.f32.xlu0 %v1460_v7 }
 0xf2f   :  { %v1463_v9 = vsel %vm100_vm0, %v1459_v8, 0.0 }
 0xf32   :  { %1464 = vadd.xlane.f32.xlu0 %v1463_v9 }
 0xfbb   :  { %v1462_v12 = vpop.xlane.xlu0 %1461 }
 0xfbc   :  { %v1466_v13 = vmul.f32 0.03125, %v1462_v12 }
 0xfbe   :  { %v1468_v14 = vadd.f32 1e-12, %v1466_v13 }
 0xfbf   :  { %v1465_v16 = vpop.xlane.xlu0 %1464 }
 0xfc0   :  { %3820 = vrsqrt.f32 %v1468_v14  ;;  %v1467_v17 = vmul.f32 0.03125, %v1465_v16 }
 0xfc2   :  { %v1469_v19 = vadd.f32 1e-12, %v1467_v17 }
 0xfc4   :  { %3822 = vrsqrt.f32 %v1469_v19 }
 0xfca   :  { %v3821_v47 = vpop.eup %3820 }
 0xfcb   :  { %v1472_v20 = vmul.f32 %v3821_v47, %v1456_v3 }
 0xfcd   :  { %v1480_v24 = vmul.f32 %v3153_v22, %v1472_v20 }
 0xfce   :  { %v3823_v23 = vpop.eup %3822 }
 0xfcf   :  { %v1473_v25 = vmul.f32 %v3823_v23, %v1457_v5  ;;  %v4322_v28 = vadd.f32 %v3154_v26, %v1480_v24 }
 0xfd1   :  { %v1481_v27 = vmul.f32 %v3153_v22, %v1473_v25 }
 0xfd3   :  { %v4324_v29 = vadd.f32 %v3154_v26, %v1481_v27 }
 0xfd5   :  { %v1495_v30 = vpack.c.bf16 %v4324_v29, %v4322_v28 }
 0xfd7   :  { %3461 = vmatmul.mubr.msk.bf16.vlgmr.msra.gmra.mrb[24].mxu0 %vm100_vm0, %v1495_v30 }
0x10aa   :  { %v1553_v32 = vpop.f32.mrb[24].mxu0 }
0x10ab   :  { %v4332_v33 = vadd.f32 %v3160_v31, %v1553_v32  ;;  %v3462_v15 = vpop.f32.mrb[25].mxu0 }
0x10ac   :  { %v1556_v18 = vpop.f32.mrb[26].mxu0 }
0x10ad   :  { %v4334_v34 = vadd.f32 %v3160_v31, %v1556_v18  ;;  %v3463_v35 = vpop.f32.mrb[27].mxu0  ;;  %3468 = vmatprep.mubr.msk.f32.mxu0 %vm220_vm2, %v4332_v33 }
0x10af   :  { %v4340_v36 = vpack.i.bf16 %v4334_v34, %v4332_v33 }
0x10b1   :  { %3722 = vrot.lane.b32.xlu1 %v4340_v36, %s3912_s9  ;;  %3717 = vrot.lane.b32.xlu0 %v4340_v36, %s3913_s30  ;;  %s4670_s9 = smov 80   ;;  %s4671_s30 = smov 112  }
0x10b5   :  { %1761 = vrot.lane.b32.xlu0 %v4332_v33, %s3914_s21 }
0x10b9   :  { %1763 = vrot.lane.b32.xlu0 %v4334_v34, %s3914_s21  ;;  %s4672_s21 = smov 56  }
0x1123   :  { %v3723_v39 = vpop.permute.xlu1 %3722  ;;  %v3718_v42 = vpop.permute.xlu0 %3717 }
0x1124   :  { %v3725_v40 = vunpack.i.h.bf16 %v3723_v39  ;;  %v3724_v45 = vunpack.i.l.bf16 %v3723_v39  ;;  %v3720_v41 = vunpack.i.h.bf16 %v3718_v42  ;;  %v3719_v43 = vunpack.i.l.bf16 %v3718_v42 }
0x1126   :  { %v3620_v44 = vpack.c.bf16 %v3720_v41, %v3719_v43  ;;  %v3630_v46 = vpack.c.bf16 %v3725_v40, %v3724_v45  ;;  %v3177_v41 = vld [vmem:[%s4667_s2 + $0x14] sm:$0xf] }
0x1127   :  { %v1762_v48 = vpop.permute.xlu0 %1761 }
0x1128   :  { %3622 = vmatprep.subr.msk.bf16.mxu0 %vm4123_vm3, %v3620_v44 }
0x1129   :  { %3625 = vmatpush3.bf16.xpose.msk.msra.mxu0 %vm4123_vm3, %v3620_v44 }
0x112a   :  { %3632 = vmatprep.subr.msk.bf16.mxu0 %vm4123_vm3, %v3630_v46 }
0x112b   :  { %v1764_v49 = vpop.permute.xlu0 %1763 }
0x1130   :  { %3469 = vmatmul.mubr.msk.f32.vlgmr.msra.gmra.mrb[18].mxu0 %vm220_vm2, %v4334_v34 }
0x1131   :  { %3635 = vmatpush3.bf16.xpose.msk.msra.mxu0 %vm4123_vm3, %v3630_v46  ;;  %3482 = vmatprep.mubr.msk.f32.mxu0 %vm220_vm2, %v1762_v48 }
0x1132   :  { %3498 = vmatprep.subr.bf16.mxu0 %v3910_v21 }
0x1138   :  { %3483 = vmatmul.mubr.msk.f32.vlgmr.msra.gmra.mrb[28].mxu0 %vm220_vm2, %v1764_v49  ;;  %v1968_v49 = vsel %vm622_vm5, %v3177_v41, 0 }
0x1139   :  { %3500 = vmatprep.mubr.msk.bf16.mxu0 %vm3911_vm1, %v3910_v21 }
0x1203   :  { %v3470_v50 = vpop.f32.mrb[18].mxu0 }
0x1204   :  { %v1646_v51 = vadd.f32 %v3470_v50, %v4145_v59  ;;  %v1640_v52 = vpop.f32.mrb[19].mxu0 }
0x1205   :  { %v1641_v53 = vadd.f32 %v1640_v52, %v4150_v60 }
0x1206   :  { %v1652_v55 = vsel %vm304_vm4, %v1646_v51, -inf }
0x1207   :  { %1653 = vmax.xlane.f32.xlu1 %v1652_v55  ;;  %v1649_v56 = vsel %vm304_vm4, %v1641_v53, -inf }
0x1208   :  { %1650 = vmax.xlane.f32.xlu0 %v1649_v56 }
0x120b   :  { %v3484_v57 = vpop.f32.mrb[28].mxu0 }
0x120c   :  { %v1843_v58 = vpop.f32.mrb[29].mxu0  ;;  %v1849_v62 = vadd.f32 %v3484_v57, %v4145_v59 }
0x120d   :  { %v1844_v61 = vadd.f32 %v1843_v58, %v4150_v60 }
0x120e   :  { %v1855_v0 = vsel %vm304_vm4, %v1849_v62, -inf }
0x120f   :  { %v1852_v63 = vsel %vm304_vm4, %v1844_v61, -inf }
0x1210   :  { %1853 = vmax.xlane.f32.xlu0 %v1852_v63 }
0x1214   :  { %1856 = vmax.xlane.f32.xlu0 %v1855_v0 }
0x1294   :  { %v1654_v37 = vpop.xlane.xlu1 %1653 }
0x1295   :  { %v1656_v38 = vsub.f32 %v1646_v51, %v1654_v37  ;;  %v1651_v1 = vpop.xlane.xlu0 %1650  ;;  %v3170_v51 = vld [vmem:[%s4667_s2 + $0x10] sm:$0xf] }
0x1296   :  { %v1655_v2 = vsub.f32 %v1641_v53, %v1651_v1  ;;  %v2015_v52 = vsel %vm622_vm5, %v3170_v51, 0 }
0x1297   :  { %v1659_v3 = vmul.f32 1.442695, %v1656_v38  ;;  %3499 = vmatpush3.bf16.msra.mxu0 %v2015_v52 }
0x1298   :  { %v1657_v4 = vmul.f32 1.442695, %v1655_v2 }
0x1299   :  { %3824 = vpow2.f32 %v1659_v3 }
0x129a   :  { %3826 = vpow2.f32 %v1657_v4 }
0x129d   :  { %v1854_v5 = vpop.xlane.xlu0 %1853 }
0x129e   :  { %v1858_v6 = vsub.f32 %v1844_v61, %v1854_v5 }
0x12a0   :  { %v1860_v7 = vmul.f32 1.442695, %v1858_v6 }
0x12a1   :  { %v1857_v60 = vpop.xlane.xlu0 %1856 }
0x12a2   :  { %3828 = vpow2.f32 %v1860_v7  ;;  %v1859_v59 = vsub.f32 %v1849_v62, %v1857_v60 }
0x12a3   :  { %v3825_v8 = vpop.eup %3824 }
0x12a4   :  { %v1862_v9 = vmul.f32 1.442695, %v1859_v59  ;;  %v1664_v10 = vsel %vm304_vm4, %v3825_v8, 0.0  ;;  %v3827_v11 = vpop.eup %3826  ;;  %v4420_v59 = vld [vmem:[%s4666_s6 + $0x8] sm:$0xff] }
0x12a5   :  { %1665 = vadd.xlane.f32.xlu0 %v1664_v10  ;;  %v1661_v12 = vsel %vm304_vm4, %v3827_v11, 0.0  ;;  %v3885_v10 = vld [vmem:[%s4666_s6] sm:$0xff]  ;;  %s4673_s6 = smov 72  }
0x12a6   :  { %3830 = vpow2.f32 %v1862_v9 }
0x12a9   :  { %1662 = vadd.xlane.f32.xlu0 %v1661_v12 }
0x12ac   :  { %v3829_v13 = vpop.eup %3828 }
0x12ad   :  { %v1864_v14 = vsel %vm304_vm4, %v3829_v13, 0.0 }
0x12ae   :  { %1865 = vadd.xlane.f32.xlu1 %v1864_v14 }
0x12b0   :  { %v3831_v16 = vpop.eup %3830 }
0x12b1   :  { %v1867_v17 = vsel %vm304_vm4, %v3831_v16, 0.0 }
0x12b2   :  { %1868 = vadd.xlane.f32.xlu0 %v1867_v17 }
0x12bf   :  { %3727 = vrot.lane.b32.xlu1 %v4340_v36, %s4669_s0  ;;  %s4675_s0 = smov 48  }
0x12c3   :  { %3737 = vrot.lane.b32.xlu1 %v4340_v36, %s4670_s9 }
0x12c7   :  { %2058 = vrot.lane.b32.xlu1 %v4332_v33, %s4671_s30 }
0x12c8   :  { %3732 = vrot.lane.b32.xlu0 %v4340_v36, %s4672_s21  ;;  %s4676_s21 = smov 40  }
0x12cc   :  { %2060 = vrot.lane.b32.xlu0 %v4334_v34, %s4671_s30 }
0x1332   :  { %v1666_v19 = vpop.xlane.xlu0 %1665 }
0x1336   :  { %v1663_v47 = vpop.xlane.xlu0 %1662 }
0x1337   :  { %3832 = vrcp.f32 %v1663_v47 }
0x1338   :  { %3834 = vrcp.f32 %v1666_v19 }
0x133b   :  { %v1866_v20 = vpop.xlane.xlu1 %1865 }
0x133c   :  { %3836 = vrcp.f32 %v1866_v20 }
0x133f   :  { %v3728_v22 = vpop.permute.xlu1 %3727  ;;  %v1869_v23 = vpop.xlane.xlu0 %1868 }
0x1340   :  { %v3730_v24 = vunpack.i.h.bf16 %v3728_v22  ;;  %v3729_v25 = vunpack.i.l.bf16 %v3728_v22  ;;  %3838 = vrcp.f32 %v1869_v23 }
0x1341   :  { %v3833_v26 = vpop.eup %3832 }
0x1342   :  { %v3626_v27 = vpack.c.bf16 %v3730_v24, %v3729_v25  ;;  %v1669_v30 = vmul.f32 %v3833_v26, %v3827_v11  ;;  %v3835_v31 = vpop.eup %3834 }
0x1343   :  { %v3733_v32 = vpop.permute.xlu0 %3732  ;;  %v1670_v39 = vmul.f32 %v3835_v31, %v3825_v8  ;;  %v3738_v42 = vpop.permute.xlu1 %3737 }
0x1344   :  { %v3735_v15 = vunpack.i.h.bf16 %v3733_v32  ;;  %v3734_v18 = vunpack.i.l.bf16 %v3733_v32  ;;  %3627 = vmatprep.subr.bf16.mxu1 %v3626_v27  ;;  %3475 = vmatprep.mubr.msk.f32.mxu1 %vm304_vm4, %v1669_v30  ;;  %v3740_v43 = vunpack.i.h.bf16 %v3738_v42  ;;  %v3739_v44 = vunpack.i.l.bf16 %v3738_v42 }
0x1345   :  { %3629 = vmatpush3.bf16.msra.mxu1 %v3626_v27 }
0x1346   :  { %v3837_v35 = vpop.eup %3836  ;;  %v3636_v40 = vpack.c.bf16 %v3735_v15, %v3734_v18  ;;  %v3640_v50 = vpack.c.bf16 %v3740_v43, %v3739_v44  ;;  %v3186_v44 = vld [vmem:[%s4667_s2 + $0x18] sm:$0xf] }
0x1347   :  { %v1872_v45 = vmul.f32 %v3837_v35, %v3829_v13  ;;  %v2059_v62 = vpop.permute.xlu1 %2058  ;;  %v2061_v63 = vpop.permute.xlu0 %2060 }
0x1348   :  { %3476 = vmatmul.mubr.msk.f32.vlgmr.msra.gmra.mrb[14].mxu1 %vm304_vm4, %v1670_v39  ;;  %3637 = vmatprep.subr.bf16.mxu1 %v3636_v40 }
0x1349   :  { %3639 = vmatpush3.bf16.msra.mxu1 %v3636_v40  ;;  %3489 = vmatprep.mubr.msk.f32.mxu1 %vm304_vm4, %v1872_v45 }
0x134a   :  { %v3839_v46 = vpop.eup %3838  ;;  %3492 = vmatprep.subr.bf16.mxu1 %v3910_v21 }
0x134b   :  { %v1873_v48 = vmul.f32 %v3839_v46, %v3831_v16  ;;  %v2265_v46 = vsel %vm622_vm5, %v3186_v44, 0 }
0x134d   :  { %3490 = vmatmul.mubr.msk.f32.vlgmr.msra.gmra.mrb[24].mxu1 %vm304_vm4, %v1873_v48 }
0x134e   :  { %3493 = vmatpush3.bf16.msra.mxu1 %v1968_v49  ;;  %3494 = vmatprep.mubr.msk.bf16.mxu1 %vm3911_vm1, %v3910_v21 }
0x134f   :  { %3642 = vmatprep.subr.msk.bf16.mxu1 %vm4123_vm3, %v3640_v50 }
0x141b   :  { %v3477_v53 = vpop.f32.mrb[14].mxu1 }
0x141c   :  { %v1749_v55 = vpop.f32.mrb[15].mxu1 }
0x141d   :  { %v1760_v56 = vpack.c.bf16 %v3477_v53, %v1749_v55 }
0x141f   :  { %3501 = vmatmul.mubr.msk.bf16.vlgmr.msra.gmra.mrb[32].mxu0 %vm220_vm2, %v1760_v56 }
0x1420   :  { %v3491_v57 = vpop.f32.mrb[24].mxu1 }
0x1421   :  { %v1952_v58 = vpop.f32.mrb[25].mxu1 }
0x1422   :  { %v1963_v61 = vpack.c.bf16 %v3491_v57, %v1952_v58 }
0x1424   :  { %3495 = vmatmul.mubr.msk.bf16.vlgmr.msra.gmra.mrb[28].mxu1 %vm220_vm2, %v1963_v61 }
0x1425   :  { %3645 = vmatpush3.bf16.xpose.msk.msra.mxu1 %vm4123_vm3, %v3640_v50  ;;  %3508 = vmatprep.mubr.msk.f32.mxu1 %vm220_vm2, %v2059_v62 }
0x1426   :  { %3518 = vmatprep.subr.bf16.mxu1 %v3910_v21 }
0x142c   :  { %3509 = vmatmul.mubr.msk.f32.vlgmr.msra.gmra.mrb[26].mxu1 %vm220_vm2, %v2061_v63 }
0x142d   :  { %3520 = vmatprep.mubr.msk.bf16.mxu1 %vm3911_vm1, %v3910_v21  ;;  %3519 = vmatpush3.bf16.msra.mxu1 %v2265_v46 }
0x14f2   :  { %v2051_v0 = vpop.f32.mrb[32].mxu0 }
0x14f3   :  { %v3502_v37 = vpop.f32.mrb[33].mxu0 }
0x14f4   :  { %v2054_v38 = vpop.f32.mrb[34].mxu0 }
0x14f5   :  { %v3503_v1 = vpop.f32.mrb[35].mxu0 }
0x14f7   :  { %v2004_v2 = vpop.f32.mrb[28].mxu1 }
0x14f8   :  { %v4413_v3 = vadd.f32 %v2051_v0, %v2004_v2  ;;  %v3496_v4 = vpop.f32.mrb[29].mxu1 }
0x14f9   :  { %v2007_v5 = vpop.f32.mrb[30].mxu1 }
0x14fa   :  { %v4415_v6 = vadd.f32 %v2054_v38, %v2007_v5  ;;  %v3497_v7 = vpop.f32.mrb[31].mxu1 }
0x14ff   :  { %v3510_v60 = vpop.f32.mrb[26].mxu1 }
0x1500   :  { %v2146_v8 = vadd.f32 %v4420_v59, %v3510_v60  ;;  %v2140_v9 = vpop.f32.mrb[27].mxu1 }
0x1501   :  { %v2141_v11 = vadd.f32 %v3885_v10, %v2140_v9 }
0x1502   :  { %v2152_v12 = vsel %vm304_vm4, %v2146_v8, -inf }
0x1503   :  { %2153 = vmax.xlane.f32.xlu0 %v2152_v12  ;;  %v2149_v13 = vsel %vm304_vm4, %v2141_v11, -inf }
0x1504   :  { %2150 = vmax.xlane.f32.xlu1 %v2149_v13 }
0x1590   :  { %v2154_v14 = vpop.xlane.xlu0 %2153 }
0x1591   :  { %v2156_v16 = vsub.f32 %v2146_v8, %v2154_v14  ;;  %v2151_v17 = vpop.xlane.xlu1 %2150 }
0x1592   :  { %v2155_v19 = vsub.f32 %v2141_v11, %v2151_v17 }
0x1593   :  { %v2159_v47 = vmul.f32 1.442695, %v2156_v16 }
0x1594   :  { %v2157_v20 = vmul.f32 1.442695, %v2155_v19 }
0x1595   :  { %3840 = vpow2.f32 %v2159_v47 }
0x1596   :  { %3842 = vpow2.f32 %v2157_v20 }
0x159f   :  { %v3841_v22 = vpop.eup %3840 }
0x15a0   :  { %v3843_v23 = vpop.eup %3842  ;;  %v2164_v24 = vsel %vm304_vm4, %v3841_v22, 0.0 }
0x15a1   :  { %2165 = vadd.xlane.f32.xlu1 %v2164_v24  ;;  %v2161_v25 = vsel %vm304_vm4, %v3843_v23, 0.0  ;;  %v3197_v24 = vld [vmem:[%s4668_s29 + $0x1] ss:$0 sm:$0xff] }
0x15a2   :  { %2162 = vadd.xlane.f32.xlu0 %v2161_v25 }
0x15b2   :  { %3747 = vrot.lane.b32.xlu1 %v4340_v36, %s4673_s6 }
0x15b6   :  { %2310 = vrot.lane.b32.xlu1 %v4332_v33, %s4674_s27 }
0x15b8   :  { %3742 = vrot.lane.b32.xlu0 %v4340_v36, %s4675_s0 }
0x15bc   :  { %2312 = vrot.lane.b32.xlu0 %v4334_v34, %s4674_s27 }
0x162e   :  { %v2166_v26 = vpop.xlane.xlu1 %2165 }
0x162f   :  { %3844 = vrcp.f32 %v2166_v26  ;;  %v2163_v27 = vpop.xlane.xlu0 %2162 }
0x1630   :  { %3846 = vrcp.f32 %v2163_v27 }
0x1632   :  { %v3748_v30 = vpop.permute.xlu1 %3747 }
0x1633   :  { %v3743_v31 = vpop.permute.xlu0 %3742  ;;  %v3750_v32 = vunpack.i.h.bf16 %v3748_v30  ;;  %v3749_v15 = vunpack.i.l.bf16 %v3748_v30 }
0x1634   :  { %v3745_v18 = vunpack.i.h.bf16 %v3743_v31  ;;  %v3744_v35 = vunpack.i.l.bf16 %v3743_v31 }
0x1635   :  { %v3650_v42 = vpack.c.bf16 %v3750_v32, %v3749_v15 }
0x1636   :  { %v3646_v39 = vpack.c.bf16 %v3745_v18, %v3744_v35  ;;  %v2311_v41 = vpop.permute.xlu1 %2310 }
0x1637   :  { %v2313_v43 = vpop.permute.xlu0 %2312 }
0x1638   :  { %3647 = vmatprep.subr.bf16.mxu0 %v3646_v39 }
0x1639   :  { %v3845_v33 = vpop.eup %3844  ;;  %3649 = vmatpush3.bf16.msra.mxu0 %v3646_v39 }
0x163a   :  { %v3847_v40 = vpop.eup %3846  ;;  %3652 = vmatprep.subr.msk.bf16.mxu0 %vm4123_vm3, %v3650_v42  ;;  %v2170_v45 = vmul.f32 %v3845_v33, %v3841_v22 }
0x163b   :  { %v2169_v34 = vmul.f32 %v3847_v40, %v3843_v23 }
0x163d   :  { %3515 = vmatprep.mubr.msk.f32.mxu0 %vm304_vm4, %v2169_v34 }
0x163e   :  { %3516 = vmatmul.mubr.msk.f32.vlgmr.msra.gmra.mrb[30].mxu0 %vm304_vm4, %v2170_v45 }
0x163f   :  { %3528 = vmatprep.mubr.msk.f32.mxu0 %vm220_vm2, %v2311_v41 }
0x1642   :  { %3655 = vmatpush3.bf16.xpose.msk.msra.mxu0 %vm4123_vm3, %v3650_v42 }
0x1643   :  { %3538 = vmatprep.subr.bf16.mxu0 %v3910_v21 }
0x1649   :  { %3529 = vmatmul.mubr.msk.f32.vlgmr.msra.gmra.mrb[36].mxu0 %vm220_vm2, %v2313_v43 }
0x164a   :  { %3540 = vmatprep.mubr.msk.bf16.mxu0 %vm3911_vm1, %v3910_v21 }
0x1711   :  { %v3517_v48 = vpop.f32.mrb[30].mxu0 }
0x1712   :  { %v2249_v49 = vpop.f32.mrb[31].mxu0 }
0x1713   :  { %v2260_v50 = vpack.c.bf16 %v3517_v48, %v2249_v49  ;;  %v3767_v49 = vld [vmem:[%s4614_s13 + $0x18] sm:$0xff]  }
0x1715   :  { %3521 = vmatmul.mubr.msk.bf16.vlgmr.msra.gmra.mrb[32].mxu1 %vm220_vm2, %v2260_v50 }
0x171c   :  { %v3530_v54 = vpop.f32.mrb[36].mxu0 }
0x171d   :  { %v2398_v51 = vadd.f32 %v4420_v59, %v3530_v54  ;;  %v2392_v52 = vpop.f32.mrb[37].mxu0 }
0x171e   :  { %v2393_v53 = vadd.f32 %v3885_v10, %v2392_v52 }
0x171f   :  { %v2404_v55 = vsel %vm304_vm4, %v2398_v51, -inf }
0x1720   :  { %2405 = vmax.xlane.f32.xlu0 %v2404_v55  ;;  %v2401_v56 = vsel %vm304_vm4, %v2393_v53, -inf }
0x1721   :  { %2402 = vmax.xlane.f32.xlu1 %v2401_v56 }
0x17ad   :  { %v2406_v57 = vpop.xlane.xlu0 %2405 }
0x17ae   :  { %v2408_v58 = vsub.f32 %v2398_v51, %v2406_v57  ;;  %v2403_v61 = vpop.xlane.xlu1 %2402 }
0x17af   :  { %v2407_v62 = vsub.f32 %v2393_v53, %v2403_v61 }
0x17b0   :  { %v2411_v63 = vmul.f32 1.442695, %v2408_v58  ;;  %v3200_v58 = vld [vmem:[%s4612_s11 + $0x1] ss:$0 sm:$0xff]  ;;  %s4677_s11 = sld [smem:[#allocation16_spill]] }
0x17b1   :  { %v2409_v0 = vmul.f32 1.442695, %v2407_v62 }
0x17b2   :  { %3848 = vpow2.f32 %v2411_v63 }
0x17b3   :  { %3850 = vpow2.f32 %v2409_v0  ;;  %v3201_v0 = vld [vmem:[%s4613_s12 + $0x1] ss:$0 sm:$0xff] }
0x17bc   :  { %v3849_v37 = vpop.eup %3848 }
0x17bd   :  { %v3851_v38 = vpop.eup %3850  ;;  %v2416_v1 = vsel %vm304_vm4, %v3849_v37, 0.0 }
0x17be   :  { %2417 = vadd.xlane.f32.xlu1 %v2416_v1  ;;  %v2413_v2 = vsel %vm304_vm4, %v3851_v38, 0.0 }
0x17bf   :  { %2414 = vadd.xlane.f32.xlu0 %v2413_v2 }
0x17d5   :  { %3752 = vrot.lane.b32.xlu0 %v4340_v36, %s4676_s21  ;;  %s4678_s21 = sld [smem:[#allocation9_spill]] }
0x17e8   :  { %v2301_v4 = vpop.f32.mrb[32].mxu1 }
0x17e9   :  { %v2308_v5 = vadd.f32 %v2301_v4, %v4413_v3  ;;  %v3522_v7 = vpop.f32.mrb[33].mxu1  ;;  %v3768_v4 = vld [vmem:[%s4616_s15 + $0x20] sm:$0xff]  }
0x17ea   :  { %v2304_v60 = vpop.f32.mrb[34].mxu1  ;;  %v3770_v7 = vld [vmem:[%s4616_s15 + $0x30] sm:$0xff]  }
0x17eb   :  { %v2309_v59 = vadd.f32 %v2304_v60, %v4415_v6  ;;  %v3523_v8 = vpop.f32.mrb[35].mxu1  ;;  %v3194_v6 = vld [vmem:[%s4667_s2 + $0x1c] sm:$0xf] }
0x17ec   :  { %v2517_v19 = vsel %vm622_vm5, %v3194_v6, 0  ;;  %v3771_v60 = vld [vmem:[%s4616_s15 + $0x38] sm:$0xff]  }
0x17ed   :  { %3539 = vmatpush3.bf16.msra.mxu0 %v2517_v19 }
0x17ee   :  { %3552 = vmatprep.subr.bf16.mxu0 %v3910_v21 }
0x184b   :  { %v2418_v9 = vpop.xlane.xlu1 %2417 }
0x184c   :  { %3852 = vrcp.f32 %v2418_v9  ;;  %v2415_v10 = vpop.xlane.xlu0 %2414 }
0x184d   :  { %3854 = vrcp.f32 %v2415_v10 }
0x1850   :  { %v3753_v11 = vpop.permute.xlu0 %3752 }
0x1851   :  { %v3755_v12 = vunpack.i.h.bf16 %v3753_v11  ;;  %v3754_v13 = vunpack.i.l.bf16 %v3753_v11 }
0x1853   :  { %v3656_v14 = vpack.c.bf16 %v3755_v12, %v3754_v13 }
0x1855   :  { %3657 = vmatprep.subr.bf16.mxu1 %v3656_v14 }
0x1856   :  { %v3853_v16 = vpop.eup %3852  ;;  %3659 = vmatpush3.bf16.msra.mxu1 %v3656_v14 }
0x1857   :  { %v3855_v36 = vpop.eup %3854  ;;  %3544 = vmatprep.subr.bf16.mxu1 %v3910_v21  ;;  %v2422_v17 = vmul.f32 %v3853_v16, %v3849_v37 }
0x1858   :  { %v2421_v3 = vmul.f32 %v3855_v36, %v3851_v38 }
0x185a   :  { %3535 = vmatprep.mubr.msk.f32.mxu1 %vm304_vm4, %v2421_v3 }
0x185b   :  { %3536 = vmatmul.mubr.msk.f32.vlgmr.msra.gmra.mrb[36].mxu1 %vm304_vm4, %v2422_v17 }
0x185c   :  { %3548 = vmatprep.mubr.msk.bf16.mxu1 %vm3911_vm1, %v3910_v21 }
0x192e   :  { %v3537_v47 = vpop.f32.mrb[36].mxu1 }
0x192f   :  { %v2501_v20 = vpop.f32.mrb[37].mxu1 }
0x1930   :  { %v2512_v22 = vpack.c.bf16 %v3537_v47, %v2501_v20 }
0x1932   :  { %3541 = vmatmul.mubr.msk.bf16.vlgmr.msra.gmra.mrb[40].mxu0 %vm220_vm2, %v2512_v22 }
0x1933   :  { %3560 = vmatprep.mubr.msk.bf16.mxu0 %vm3911_vm1, %v3910_v21  ;;  %3553 = vmatpush3.bf16.msra.mxu0 %v3768_v4 }
0x1934   :  { %3554 = vmatprep.subr.bf16.mxu0 %v3910_v21 }
0x1a05   :  { %v2553_v23 = vpop.f32.mrb[40].mxu0 }
0x1a06   :  { %v2560_v25 = vadd.f32 %v2553_v23, %v2308_v5  ;;  %v3542_v26 = vpop.f32.mrb[41].mxu0  ;;  %v3769_v5 = vld [vmem:[%s4616_s15 + $0x28] sm:$0xff]  }
0x1a07   :  { %v2556_v27 = vpop.f32.mrb[42].mxu0  ;;  %3555 = vmatpush3.bf16.msra.mxu0 %v3769_v5 }
0x1a08   :  { %v2570_v30 = vadd.f32 %v3197_v24, %v2560_v25  ;;  %v2561_v31 = vadd.f32 %v2556_v27, %v2309_v59  ;;  %v3543_v32 = vpop.f32.mrb[43].mxu0  ;;  %3556 = vmatprep.subr.bf16.mxu0 %v3910_v21  ;;  %v3207_v59 = vld [vmem:[%s4615_s14 + $0x1] ss:$0 sm:$0xff]  ;;  %s3087_s14 = sshll.u32 %s3923_s1, 4  ;;  %s3088_s14 = int_to_ptr.vmem [resolvable:$true] %s3087_s14 }
0x1a09   :  { %s3886_s15 = scalar_lea.vmem %s3088_s14, 256  ;;  %p3891_p1 = scmp.lt.s32.totalorder %s3088_s14, %s3088_s14 }
0x1a0a   :  { %v2571_v15 = vadd.f32 %v3197_v24, %v2561_v31  ;;  %v2572_v18 = vadd.f32 %v2570_v30, %v4322_v28  ;;  %p3887_p0 = scmp.ne.s32.totalorder %s3088_s14, %s3886_s15  ;;  %p3892_p2 = scmp.lt.s32.totalorder %s3886_s15, %s3886_s15 }
0x1a0b   :  { %3557 = vmatpush3.bf16.msra.mxu0 %v3770_v7  ;;  %v3229_v7 = vld [vmem:[%s4619_s18 + $0x1] ss:$0 sm:$0xff] }
0x1a0c   :  { %v2578_v35 = vsel %vm100_vm0, %v2572_v18, 0.0  ;;  %v2573_v39 = vadd.f32 %v2571_v15, %v4324_v29  ;;  %v3766_v29 = vld [vmem:[%s4614_s13 + $0x10] sm:$0xff]   ;;  %3558 = vmatprep.subr.bf16.mxu0 %v3910_v21  ;;  %p3893_p3 = por %p3892_p2, %p3891_p1 }
0x1a0d   :  { %2579 = vadd.xlane.f32.xlu1 %v2578_v35  ;;  %3545 = vmatpush3.bf16.msra.mxu1 %v3766_v29 }
0x1a0e   :  { %v2581_v42 = vsel %vm100_vm0, %v2573_v39, 0.0  ;;  %3546 = vmatprep.subr.bf16.mxu1 %v3910_v21  ;;  %p3894_p4 = pnand %p3893_p3, %p3887_p0 }
0x1a0f   :  { %3559 = vmatpush3.bf16.msra.mxu0 %v3771_v60 }
0x1a11   :  { %2582 = vadd.xlane.f32.xlu1 %v2581_v42  ;;  %3547 = vmatpush3.bf16.msra.mxu1 %v3767_v49 }
0x1a12   :  { %3564 = vmatprep.subr.bf16.mxu1 %v3910_v21 }
0x1a9a   :  { %v2580_v33 = vpop.xlane.xlu1 %2579 }
0x1a9b   :  { %v2584_v40 = vmul.f32 0.03125, %v2580_v33 }
0x1a9d   :  { %v2586_v34 = vsub.f32 %v2572_v18, %v2584_v40  ;;  %v3220_v18 = vld [vmem:[%s4617_s16 + $0x1] ss:$0 sm:$0xff] }
0x1a9e   :  { %v2583_v45 = vpop.xlane.xlu1 %2582 }
0x1a9f   :  { %v2585_v41 = vmul.f32 0.03125, %v2583_v45  ;;  %v2588_v43 = vmul.f32 %v2586_v34, %v2586_v34 }
0x1aa1   :  { %v2587_v44 = vsub.f32 %v2573_v39, %v2585_v41  ;;  %v2590_v46 = vsel %vm100_vm0, %v2588_v43, 0.0 }
0x1aa2   :  { %2591 = vadd.xlane.f32.xlu1 %v2590_v46 }
0x1aa3   :  { %v2589_v48 = vmul.f32 %v2587_v44, %v2587_v44 }
0x1aa5   :  { %v2593_v28 = vsel %vm100_vm0, %v2589_v48, 0.0 }
0x1aa6   :  { %2594 = vadd.xlane.f32.xlu1 %v2593_v28 }
0x1b2f   :  { %v2592_v50 = vpop.xlane.xlu1 %2591 }
0x1b30   :  { %v2596_v54 = vmul.f32 0.03125, %v2592_v50 }
0x1b32   :  { %v2598_v51 = vadd.f32 1e-12, %v2596_v54 }
0x1b33   :  { %v2595_v52 = vpop.xlane.xlu1 %2594 }
0x1b34   :  { %3856 = vrsqrt.f32 %v2598_v51  ;;  %v2597_v53 = vmul.f32 0.03125, %v2595_v52 }
0x1b36   :  { %v2599_v55 = vadd.f32 1e-12, %v2597_v53 }
0x1b38   :  { %3858 = vrsqrt.f32 %v2599_v55  ;;  %v3772_v55 = vld [vmem:[%s4620_s19] sm:$0xff]  }
0x1b3e   :  { %v3857_v56 = vpop.eup %3856 }
0x1b3f   :  { %v2602_v57 = vmul.f32 %v3857_v56, %v2586_v34  ;;  %v3773_v56 = vld [vmem:[%s4620_s19 + $0x8] sm:$0xff]  }
0x1b41   :  { %v2610_v62 = vmul.f32 %v3200_v58, %v2602_v57 }
0x1b42   :  { %v3859_v61 = vpop.eup %3858 }
0x1b43   :  { %v2603_v63 = vmul.f32 %v3859_v61, %v2587_v44  ;;  %v2618_v38 = vadd.f32 %v3201_v0, %v2610_v62 }
0x1b45   :  { %v2611_v37 = vmul.f32 %v3200_v58, %v2603_v63 }
0x1b47   :  { %v2619_v1 = vadd.f32 %v3201_v0, %v2611_v37 }
0x1b49   :  { %v2625_v2 = vpack.c.bf16 %v2619_v1, %v2618_v38 }
0x1b4b   :  { %3549 = vmatmul.mubr.msk.bf16.vlgmr.msra.gmra.mrb[40].mxu1 %vm100_vm0, %v2625_v2 }
0x1b4c   :  { %3568 = vmatprep.mubr.msk.bf16.mxu1 %vm3911_vm1, %v3910_v21  ;;  %3565 = vmatpush3.bf16.msra.mxu1 %v3772_v55 }
0x1b4d   :  { %3566 = vmatprep.subr.bf16.mxu1 %v3910_v21 }
0x1b50   :  { %3567 = vmatpush3.bf16.msra.mxu1 %v3773_v56 }
0x1b51   :  { %3572 = vmatprep.subr.bf16.mxu1 %v3910_v21 }
0x1c1e   :  { %v2683_v8 = vpop.f32.mrb[40].mxu1 }
0x1c1f   :  { %v2684_v9 = vadd.f32 %v3207_v59, %v2683_v8  ;;  %v3550_v10 = vpop.f32.mrb[41].mxu1 }
0x1c20   :  { %v2686_v11 = vpop.f32.mrb[42].mxu1  ;;  %v3230_v10 = vld [vmem:[%s4621_s20] ss:$0 sm:$0xff] }
0x1c21   :  { %v2690_v12 = vmul.f32 %v2684_v9, %v2684_v9  ;;  %v2687_v13 = vadd.f32 %v3207_v59, %v2686_v11  ;;  %v3551_v14 = vpop.f32.mrb[43].mxu1 }
0x1c23   :  { %v2692_v16 = vmul.f32 %v2690_v12, %v2684_v9  ;;  %v2691_v36 = vmul.f32 %v2687_v13, %v2687_v13 }
0x1c25   :  { %v2694_v3 = vmul.f32 0.044715, %v2692_v16  ;;  %v2693_v17 = vmul.f32 %v2691_v36, %v2687_v13 }
0x1c27   :  { %v2696_v6 = vadd.f32 %v2694_v3, %v2684_v9  ;;  %v2695_v19 = vmul.f32 0.044715, %v2693_v17 }
0x1c29   :  { %v2698_v47 = vmul.f32 0.7978846, %v2696_v6  ;;  %v2697_v20 = vadd.f32 %v2695_v19, %v2687_v13 }
0x1c2b   :  { %3860 = vtanh.f32 %v2698_v47  ;;  %v2699_v22 = vmul.f32 0.7978846, %v2697_v20 }
0x1c2d   :  { %3862 = vtanh.f32 %v2699_v22 }
0x1c35   :  { %v3861_v23 = vpop.eup %3860 }
0x1c36   :  { %v2702_v24 = vadd.f32 1.0, %v3861_v23 }
0x1c37   :  { %v3863_v25 = vpop.eup %3862 }
0x1c38   :  { %v2704_v26 = vmul.f32 0.5, %v2702_v24  ;;  %v2703_v27 = vadd.f32 1.0, %v3863_v25 }
0x1c3a   :  { %v2705_v30 = vmul.f32 0.5, %v2703_v27  ;;  %v2706_v31 = vmul.f32 %v2704_v26, %v2684_v9 }
0x1c3c   :  { %v2707_v32 = vmul.f32 %v2705_v30, %v2687_v13 }
0x1c3e   :  { %v2717_v15 = vpack.c.bf16 %v2707_v32, %v2706_v31 }
0x1c40   :  { %3561 = vmatmul.mubr.msk.bf16.vlgmr.msra.gmra.mrb[44].mxu0 %vm1399_vm6, %v2717_v15 }
0x1d13   :  { %v2787_v35 = vpop.f32.mrb[44].mxu0 }
0x1d14   :  { %v2788_v39 = vadd.f32 %v3220_v18, %v2787_v35  ;;  %v3562_v42 = vpop.f32.mrb[45].mxu0 }
0x1d15   :  { %v2790_v33 = vpop.f32.mrb[46].mxu0 }
0x1d16   :  { %v2791_v40 = vadd.f32 %v3220_v18, %v2790_v33  ;;  %v3563_v34 = vpop.f32.mrb[47].mxu0  ;;  %v2794_v45 = vadd.f32 %v2788_v39, %v2618_v38 }
0x1d18   :  { %v2800_v41 = vsel %vm100_vm0, %v2794_v45, 0.0  ;;  %v2795_v43 = vadd.f32 %v2791_v40, %v2619_v1  ;;  %v3228_v1 = vld [vmem:[%s4618_s17 + $0x1] ss:$0 sm:$0xff] }
0x1d19   :  { %2801 = vadd.xlane.f32.xlu1 %v2800_v41 }
0x1d1a   :  { %v2803_v44 = vsel %vm100_vm0, %v2795_v43, 0.0 }
0x1d1d   :  { %2804 = vadd.xlane.f32.xlu1 %v2803_v44 }
0x1da6   :  { %v2802_v46 = vpop.xlane.xlu1 %2801 }
0x1da7   :  { %v2806_v48 = vmul.f32 0.03125, %v2802_v46 }
0x1da9   :  { %v2808_v28 = vsub.f32 %v2794_v45, %v2806_v48 }
0x1daa   :  { %v2805_v29 = vpop.xlane.xlu1 %2804 }
0x1dab   :  { %v2807_v49 = vmul.f32 0.03125, %v2805_v29  ;;  %v2810_v50 = vmul.f32 %v2808_v28, %v2808_v28  ;;  %v3774_v29 = vld [vmem:[%s4624_s23] sm:$0xff]  }
0x1dad   :  { %v2809_v54 = vsub.f32 %v2795_v43, %v2807_v49  ;;  %v2812_v51 = vsel %vm100_vm0, %v2810_v50, 0.0  ;;  %v3775_v49 = vld [vmem:[%s4624_s23 + $0x8] sm:$0xff]  }
0x1dae   :  { %2813 = vadd.xlane.f32.xlu0 %v2812_v51 }
0x1daf   :  { %v2811_v52 = vmul.f32 %v2809_v54, %v2809_v54 }
0x1db1   :  { %v2815_v53 = vsel %vm100_vm0, %v2811_v52, 0.0 }
0x1db2   :  { %2816 = vadd.xlane.f32.xlu1 %v2815_v53 }
0x1e3b   :  { %v2814_v57 = vpop.xlane.xlu0 %2813 }
0x1e3c   :  { %v2818_v58 = vmul.f32 0.03125, %v2814_v57 }
0x1e3e   :  { %v2820_v61 = vadd.f32 1e-12, %v2818_v58  ;;  %v3234_v58 = vld [vmem:[%s4677_s11] ss:$0 sm:$0xff] }
0x1e3f   :  { %v2817_v62 = vpop.xlane.xlu1 %2816 }
0x1e40   :  { %3864 = vrsqrt.f32 %v2820_v61  ;;  %v2819_v63 = vmul.f32 0.03125, %v2817_v62 }
0x1e42   :  { %v2821_v0 = vadd.f32 1e-12, %v2819_v63 }
0x1e44   :  { %3866 = vrsqrt.f32 %v2821_v0 }
0x1e4a   :  { %v3865_v37 = vpop.eup %3864 }
0x1e4b   :  { %v2824_v38 = vmul.f32 %v3865_v37, %v2808_v28 }
0x1e4d   :  { %v2832_v4 = vmul.f32 %v3228_v1, %v2824_v38 }
0x1e4e   :  { %v3867_v2 = vpop.eup %3866 }
0x1e4f   :  { %v2825_v5 = vmul.f32 %v3867_v2, %v2809_v54  ;;  %v2840_v59 = vadd.f32 %v3229_v7, %v2832_v4  ;;  %v3236_v2 = vld [vmem:[%s4625_s24] ss:$0 sm:$0xff] }
0x1e51   :  { %v2833_v60 = vmul.f32 %v3228_v1, %v2825_v5 }
0x1e53   :  { %v2841_v8 = vadd.f32 %v3229_v7, %v2833_v60 }
0x1e55   :  { %v2846_v9 = vpack.c.bf16 %v2841_v8, %v2840_v59 }
0x1e57   :  { %3569 = vmatmul.mubr.msk.bf16.vlgmr.msra.gmra.mrb[44].mxu1 %vm100_vm0, %v2846_v9 }
0x1e58   :  { %3576 = vmatprep.mubr.msk.bf16.mxu1 %vm3911_vm1, %v3910_v21  ;;  %3573 = vmatpush3.bf16.msra.mxu1 %v3774_v29 }
0x1e59   :  { %3574 = vmatprep.subr.bf16.mxu1 %v3910_v21  ;;  %v3235_v21 = vld [vmem:[%s4623_s22] ss:$0 sm:$0xff] }
0x1e5c   :  { %3575 = vmatpush3.bf16.msra.mxu1 %v3775_v49 }
0x1f2a   :  { %v2903_v11 = vpop.f32.mrb[44].mxu1 }
0x1f2b   :  { %v2904_v12 = vadd.f32 %v3230_v10, %v2903_v11  ;;  %v3570_v13 = vpop.f32.mrb[45].mxu1 }
0x1f2c   :  { %v2906_v14 = vpop.f32.mrb[46].mxu1 }
0x1f2d   :  { %v2910_v16 = vmul.f32 %v2904_v12, %v2904_v12  ;;  %v2907_v36 = vadd.f32 %v3230_v10, %v2906_v14  ;;  %v3571_v3 = vpop.f32.mrb[47].mxu1 }
0x1f2e   :  { %v3067_v3 = vld [vmem:[%s4678_s21] sm:$0xff] }
0x1f2f   :  { %v2912_v17 = vmul.f32 %v2910_v16, %v2904_v12  ;;  %v2911_v6 = vmul.f32 %v2907_v36, %v2907_v36 }
0x1f31   :  { %v2914_v19 = vmul.f32 0.044715, %v2912_v17  ;;  %v2913_v47 = vmul.f32 %v2911_v6, %v2907_v36 }
0x1f33   :  { %v2916_v20 = vadd.f32 %v2914_v19, %v2904_v12  ;;  %v2915_v22 = vmul.f32 0.044715, %v2913_v47  ;;  %v3068_v47 = vld [vmem:[%s4678_s21 + $0x8] sm:$0xff] }
0x1f35   :  { %v2917_v23 = vadd.f32 %v2915_v22, %v2907_v36  ;;  %v2918_v24 = vmul.f32 0.7978846, %v2916_v20 }
0x1f37   :  { %3868 = vtanh.f32 %v2918_v24  ;;  %v2919_v25 = vmul.f32 0.7978846, %v2917_v23 }
0x1f39   :  { %3870 = vtanh.f32 %v2919_v25 }
0x1f41   :  { %v3869_v26 = vpop.eup %3868 }
0x1f42   :  { %v2922_v27 = vadd.f32 1.0, %v3869_v26 }
0x1f43   :  { %v3871_v30 = vpop.eup %3870 }
0x1f44   :  { %v2924_v31 = vmul.f32 0.5, %v2922_v27  ;;  %v2923_v32 = vadd.f32 1.0, %v3871_v30 }
0x1f46   :  { %v2926_v15 = vmul.f32 %v2924_v31, %v2904_v12  ;;  %v2925_v18 = vmul.f32 0.5, %v2923_v32 }
0x1f48   :  { %v2930_v35 = vsel %vm100_vm0, %v2926_v15, 0.0  ;;  %v2927_v39 = vmul.f32 %v2925_v18, %v2907_v36 }
0x1f49   :  { %2931 = vadd.xlane.f32.xlu1 %v2930_v35 }
0x1f4a   :  { %v2933_v42 = vsel %vm100_vm0, %v2927_v39, 0.0 }
0x1f4d   :  { %2934 = vadd.xlane.f32.xlu1 %v2933_v42 }
0x1fd6   :  { %v2932_v33 = vpop.xlane.xlu1 %2931 }
0x1fd7   :  { %v2936_v40 = vmul.f32 0.03125, %v2932_v33 }
0x1fd9   :  { %v2938_v34 = vsub.f32 %v2926_v15, %v2936_v40 }
0x1fda   :  { %v2935_v45 = vpop.xlane.xlu1 %2934 }
0x1fdb   :  { %v2937_v41 = vmul.f32 0.03125, %v2935_v45  ;;  %v2940_v43 = vmul.f32 %v2938_v34, %v2938_v34 }
0x1fdd   :  { %v2939_v44 = vsub.f32 %v2927_v39, %v2937_v41  ;;  %v2942_v46 = vsel %vm100_vm0, %v2940_v43, 0.0 }
0x1fde   :  { %2943 = vadd.xlane.f32.xlu1 %v2942_v46 }
0x1fdf   :  { %v2941_v48 = vmul.f32 %v2939_v44, %v2939_v44 }
0x1fe1   :  { %v2945_v28 = vsel %vm100_vm0, %v2941_v48, 0.0 }
0x1fe2   :  { %2946 = vadd.xlane.f32.xlu1 %v2945_v28 }
0x206b   :  { %v2944_v50 = vpop.xlane.xlu1 %2943 }
0x206c   :  { %v2948_v54 = vmul.f32 0.03125, %v2944_v50 }
0x206e   :  { %v2950_v51 = vadd.f32 1e-12, %v2948_v54 }
0x206f   :  { %v2947_v52 = vpop.xlane.xlu1 %2946 }
0x2070   :  { %3872 = vrsqrt.f32 %v2950_v51  ;;  %v2949_v53 = vmul.f32 0.03125, %v2947_v52 }
0x2072   :  { %v2951_v55 = vadd.f32 1e-12, %v2949_v53 }
0x2074   :  { %3874 = vrsqrt.f32 %v2951_v55 }
0x207a   :  { %v3873_v56 = vpop.eup %3872 }
0x207b   :  { %v2954_v57 = vmul.f32 %v3873_v56, %v2938_v34 }
0x207d   :  { %v2962_v62 = vmul.f32 %v3234_v58, %v2954_v57 }
0x207e   :  { %v3875_v61 = vpop.eup %3874 }
0x207f   :  { %v2955_v63 = vmul.f32 %v3875_v61, %v2939_v44  ;;  %v2970_v37 = vadd.f32 %v3235_v21, %v2962_v62 }
0x2081   :  { %v2963_v0 = vmul.f32 %v3234_v58, %v2955_v63 }
0x2083   :  { %v2971_v38 = vadd.f32 %v3235_v21, %v2963_v0 }
0x2085   :  { %v2976_v1 = vpack.c.bf16 %v2971_v38, %v2970_v37 }
0x2087   :  { %3577 = vmatmul.mubr.msk.bf16.vlgmr.msra.gmra.mrb[48].mxu1 %vm100_vm0, %v2976_v1 }
0x215a   :  { %v3033_v4 = vpop.f32.mrb[48].mxu1 }
0x215b   :  { %v3034_v5 = vadd.f32 %v3236_v2, %v3033_v4  ;;  %v3578_v7 = vpop.f32.mrb[49].mxu1 }
0x215c   :  { %v3036_v60 = vpop.f32.mrb[50].mxu1 }
0x215d   :  { %v3037_v59 = vadd.f32 %v3236_v2, %v3036_v60  ;;  %v3579_v8 = vpop.f32.mrb[51].mxu1  ;;  %v3043_v9 = vsel %vm3040_vm7, %v3034_v5, -inf  ;;  %3041 = vst.msk [vmem:[#allocation2] sm:$0xff] %vm3040_vm7, %v3034_v5  ;;  %v3069_v19 = vmul.f32 %v3067_v3, %v3034_v5 }
0x215e   :  { %3044 = vmax.xlane.f32.xlu1 %v3043_v9 }
0x215f   :  { %3042 = vst.msk [vmem:[#allocation2 + $0x8] sm:$0xff] %vm3040_vm7, %v3037_v59  ;;  %v3046_v10 = vsel %vm3040_vm7, %v3037_v59, -inf  ;;  %v3071_v22 = vsel %vm3040_vm7, %v3069_v19, 0.0  ;;  %v3070_v24 = vmul.f32 %v3068_v47, %v3037_v59 }
0x2161   :  { %v3074_v25 = vsel %vm3040_vm7, %v3070_v24, 0.0 }
0x2162   :  { %3047 = vmax.xlane.f32.xlu1 %v3046_v10 }
0x21eb   :  { %v3045_v11 = vpop.xlane.xlu1 %3044 }
0x21ec   :  { %v3049_v12 = vsub.f32 %v3034_v5, %v3045_v11 }
0x21ee   :  { %v3051_v13 = vmul.f32 1.442695, %v3049_v12 }
0x21ef   :  { %v3048_v14 = vpop.xlane.xlu1 %3047 }
0x21f0   :  { %3876 = vpow2.f32 %v3051_v13  ;;  %v3050_v16 = vsub.f32 %v3037_v59, %v3048_v14 }
0x21f2   :  { %v3053_v36 = vmul.f32 1.442695, %v3050_v16 }
0x21f4   :  { %3878 = vpow2.f32 %v3053_v36 }
0x21fa   :  { %v3877_v17 = vpop.eup %3876 }
0x21fb   :  { %v3055_v6 = vsel %vm3040_vm7, %v3877_v17, 0.0 }
0x21fc   :  { %3056 = vadd.xlane.f32.xlu0 %v3055_v6 }
0x21fe   :  { %v3879_v20 = vpop.eup %3878 }
0x21ff   :  { %v3058_v23 = vsel %vm3040_vm7, %v3879_v20, 0.0 }
0x2200   :  { %3072 = vadd.xlane.f32.xlu0 %v3071_v22  ;;  %3059 = vadd.xlane.f32.xlu1 %v3058_v23 }
0x2204   :  { %3075 = vadd.xlane.f32.xlu1 %v3074_v25 }
0x2205   :  { %3897 = shalt.err (!%p3894_p4)
}
0x2206   :  { %s3898_s2 = scalar_lea.hbm %s4626_s25, 256 }
0x2207   :  { %p3899_p5 = scmp.ne.s32.totalorder %s4626_s25, %s3898_s2  ;;  %p3902_p6 = scmp.lt.u32.totalorder %s3898_s2, %s4626_s25 }
0x2209   :  { %p3904_p7 = pnand %p3902_p6, %p3899_p5 }
0x220b   :  { %3907 = shalt.err (!%p3904_p7)
}
0x220c   :  { %s3924_s5 = smov 128   ;;  %s3925_s28 = smov 8   ;;  %vm3079_vm8 = vcmask 7168  }
0x220d   :  { %3093 = dma.vmem_to_hbm [thread:$0]  %s3088_s14, 256, %s4626_s25, [#allocation3], %s3924_s5, %s3924_s5, %s3925_s28  }
0x2289   :  { %v3057_v26 = vpop.xlane.xlu0 %3056 }
0x228a   :  { %3880 = vlog2.f32 %v3057_v26 }
0x228d   :  { %v3060_v27 = vpop.xlane.xlu1 %3059  ;;  %v3073_v18 = vpop.xlane.xlu0 %3072 }
0x228e   :  { %3882 = vlog2.f32 %v3060_v27 }
0x2291   :  { %v3076_v33 = vpop.xlane.xlu1 %3075 }
0x2294   :  { %v3881_v30 = vpop.eup %3880 }
0x2295   :  { %v3062_v31 = vmul.f32 0.6931472, %v3881_v30 }
0x2297   :  { %v3065_v32 = vadd.f32 %v3062_v31, %v3045_v11 }
0x2298   :  { %v3883_v15 = vpop.eup %3882 }
0x2299   :  { %v3077_v35 = vsub.f32 %v3065_v32, %v3073_v18  ;;  %v3064_v39 = vmul.f32 0.6931472, %v3883_v15 }
0x229b   :  { %3080 = vst.msk [vmem:[%s4627_s26] sm:$0xff] %vm3079_vm8, %v3077_v35  ;;  %v3066_v42 = vadd.f32 %v3064_v39, %v3048_v14 }
0x229d   :  { %v3078_v40 = vsub.f32 %v3066_v42, %v3076_v33 }
0x229f   :  { %3081 = vst.msk [vmem:[%s4627_s26 + $0x8] sm:$0xff] %vm3079_vm8, %v3078_v40 }
0x22a0   :  { %3908 = dma.done.wait [#allocation3], 256  }
0x22a1   :  { %3909 = vsyncadd [#allocation3], 4294967040 }
0x22a2   :  { %3101 = vsyncpa [#allocation3], 1 }

</bundles_post_ra>
